<compile_context>
chip_gen: v5e
topology: v5e:2x2
jax: 0.10.0
libtpu: 0.0.40
codegen_flags: <defaults>
</compile_context>

<pallas_src>
import functools

import jax
import jax.numpy as jnp
from jax import lax
from jax.experimental import pallas as pl
from jax.experimental.pallas import tpu as pltpu


def _round_up(x, m):
    return ((x + m - 1) // m) * m


def _vmem_limit_bytes():
    """Generation-aware scoped-VMEM limit (~75% of physical, capped at 96 MiB)."""
    try:
        cap = pltpu.get_tpu_info().vmem_capacity_bytes
    except Exception:
        cap = 64 * 1024 * 1024          # conservative fallback (v7x physical VMEM)
    return min(int(cap * 3 // 4), 96 * 1024 * 1024)


# ---------------------------------------------------------------------------
# Kernels
# ---------------------------------------------------------------------------
def _conv_tile(x_ref, w_ref, *, kH, kW, stride, tile_ho, Wo, Cin, Cpad):
    """Direct strided conv of one output-row strip, accumulated per tap on the MXU.

    x_ref block: (1, s*s, Hs, Wq, Cin)  phase-split padded input (bf16)
    w_ref block: (kH*kW, Cin, Cpad)     weights (bf16, Cout lane-padded)
    returns f32 (tile_ho*Wo, Cpad)
    """
    tm = tile_ho * Wo
    acc = jnp.zeros((tm, Cpad), jnp.float32)
    for i in range(kH):
        for j in range(kW):
            ph = (i % stride) * stride + (j % stride)      # phase = rh*s + rw
            win = x_ref[0, ph,
                        i // stride:i // stride + tile_ho,
                        j // stride:j // stride + Wo, :]   # (tile_ho, Wo, Cin)
            acc = acc + jnp.dot(win.reshape(tm, Cin), w_ref[i * kW + j],
                                preferred_element_type=jnp.float32)
    return acc


def _stats_kernel(x_ref, w_ref, sum_ref, sq_ref, *, conv_args):
    """Pass 1 (recompute variant): conv tile + per-channel partial sum / sumsq."""
    conv = _conv_tile(x_ref, w_ref, **conv_args)
    sum_ref[0] = jnp.sum(conv, axis=0, keepdims=True)
    sq_ref[0] = jnp.sum(conv * conv, axis=0, keepdims=True)


def _stats_store_kernel(x_ref, w_ref, sum_ref, sq_ref, conv_ref, *, conv_args):
    """Pass 1 (store variant): also writes the conv tile (bf16) for pass 2."""
    conv = _conv_tile(x_ref, w_ref, **conv_args)
    sum_ref[0] = jnp.sum(conv, axis=0, keepdims=True)
    sq_ref[0] = jnp.sum(conv * conv, axis=0, keepdims=True)
    conv_ref[...] = conv.astype(conv_ref.dtype)


def _apply_recompute_kernel(x_ref, w_ref, scale_ref, bias_ref, out_ref, *,
                            conv_args, neg_slope, Cout):
    """Pass 2 (recompute variant): redo the conv, apply folded BN + LeakyReLU."""
    conv = _conv_tile(x_ref, w_ref, **conv_args)
    y = conv * scale_ref[...] + bias_ref[...]
    y = jnp.where(y >= 0, y, neg_slope * y)
    out_ref[...] = y[:, :Cout].astype(out_ref.dtype)      # store only real channels


def _apply_stored_kernel(conv_ref, scale_ref, bias_ref, out_ref, *, neg_slope, Cout):
    """Pass 2 (store variant): pure elementwise affine + LeakyReLU over bf16 conv."""
    y = conv_ref[...].astype(jnp.float32) * scale_ref[...] + bias_ref[...]
    y = jnp.where(y >= 0, y, neg_slope * y)
    out_ref[...] = y[:, :Cout].astype(out_ref.dtype)


# ---------------------------------------------------------------------------
# Wrapper
# ---------------------------------------------------------------------------
def downsample_forward(x_nchw, weight, gamma, beta, *, stride, padding,
                       eps=1e-5, neg_slope=0.2, compute_dtype=jnp.bfloat16,
                       out_dtype=jnp.float32, channels_last=False, mode="auto"):
    """x_nchw: [N, Cin, H, W]; weight: [Cout, Cin, kH, kW] (PyTorch conventions).

    channels_last=True returns NHWC (drops the final transpose); out_dtype=bf16
    halves output HBM traffic.  mode: "auto" | "recompute" | "store".
    """
    N, Cin, H, W = x_nchw.shape
    Cout, _, kH, kW = weight.shape
    s = stride
    Ho = (H + 2 * padding - kH) // s + 1
    Wo = (W + 2 * padding - kW) // s + 1
    M = N * Ho * Wo
    Cpad = _round_up(Cout, 128)
    dh, dw = (kH - 1) // s, (kW - 1) // s
    Hq = -(-(H + 2 * padding) // s)
    Wq = -(-(W + 2 * padding) // s)

    # ---- glue (one cheap pass over the input; no kH*kW im2col blow-up) ----
    # NCHW -> NHWC bf16, zero-pad, phase-split H and W by the stride so every conv
    # tap is a contiguous slice inside the kernel.
    x = jnp.transpose(x_nchw, (0, 2, 3, 1)).astype(compute_dtype)
    x = jnp.pad(x, ((0, 0),
                    (padding, Hq * s - H - padding),
                    (padding, Wq * s - W - padding),
                    (0, 0)))
    x = x.reshape(N, Hq, s, Wq, s, Cin).transpose(0, 2, 4, 1, 3, 5)
    x = x.reshape(N, s * s, Hq, Wq, Cin)

    # PyTorch weight [Cout, Cin, kH, kW] -> [kH*kW, Cin, Cout] -> lane-pad Cout.
    w_mat = jnp.transpose(weight, (2, 3, 1, 0)).reshape(kH * kW, Cin, Cout)
    w_mat = jnp.pad(w_mat, ((0, 0), (0, 0), (0, Cpad - Cout))).astype(compute_dtype)

    # ---- tile selection: generation-aware VMEM budget, includes the weight ----
    vmem_limit = _vmem_limit_bytes()
    w_bytes = 2 * kH * kW * Cin * Cpad * 2          # double-buffered bf16 weight block
    budget = max(vmem_limit - w_bytes - 64 * 1024, 1 << 20)

    def tile_bytes(tho):
        hs = tho + dh
        strip = 2 * s * s * hs * Wq * Cin * 2       # double-buffered bf16 input strip
        acc = tho * Wo * Cpad * 4                   # f32 conv accumulator
        outs = 2 * tho * Wo * Cpad * 4              # out / conv blocks (conservative)
        return strip + acc + outs

    divs = [d for d in range(Ho, 0, -1) if Ho % d == 0 and (d * Wo) % 8 == 0]
    if not divs:
        divs = [d for d in range(Ho, 0, -1) if Ho % d == 0]
    fitting = [d for d in divs if tile_bytes(d) <= budget] or divs[-1:]
    # v7x megacore: prefer >= 2 grid steps so both TensorCores get work.
    multi = [d for d in fitting if N * (Ho // d) >= 2]
    tile_ho = (multi or fitting)[0]
    T = Ho // tile_ho
    NT = N * T
    Hs = tile_ho + dh
    tile_m = tile_ho * Wo

    # Overlapping Ho-strips (overlap = dh rows of Hq, tiny) so plain Blocked
    # BlockSpecs can tile them; a single strip is just a slice (no duplication).
    strips = jnp.stack(
        [x[:, :, t * tile_ho:t * tile_ho + Hs] for t in range(T)], axis=1
    ).reshape(NT, s * s, Hs, Wq, Cin)

    conv_args = dict(kH=kH, kW=kW, stride=s, tile_ho=tile_ho, Wo=Wo, Cin=Cin, Cpad=Cpad)
    cparams = pltpu.CompilerParams(
        dimension_semantics=("parallel",),
        vmem_limit_bytes=vmem_limit,
    )

    x_spec = pl.BlockSpec((1, s * s, Hs, Wq, Cin), lambda i: (i, 0, 0, 0, 0))
    w_spec = pl.BlockSpec((kH * kW, Cin, Cpad), lambda i: (0, 0, 0))
    stat_spec = pl.BlockSpec((1, 1, Cpad), lambda i: (i, 0, 0))
    vec_spec = pl.BlockSpec((1, Cpad), lambda i: (0, 0))
    out_spec = pl.BlockSpec((tile_m, Cout), lambda i: (i, 0))
    conv_spec = pl.BlockSpec((tile_m, Cpad), lambda i: (i, 0))

    # Recompute extra HBM ~ s*s*Cin*2 B / output element (re-read phase-split input);
    # store extra ~ 2*Cpad*2 B (bf16 conv round-trip).  Pick the cheaper one.
    if mode == "auto":
        recompute = (s * s * Cin) <= 2 * Cpad
    else:
        recompute = (mode == "recompute")

    # ---- pass 1: conv on the MXU + per-tile partial BN statistics ----
    stats_shapes = (jax.ShapeDtypeStruct((NT, 1, Cpad), jnp.float32),
                    jax.ShapeDtypeStruct((NT, 1, Cpad), jnp.float32))
    if recompute:
        sums, sqs = pl.pallas_call(
            functools.partial(_stats_kernel, conv_args=conv_args),
            out_shape=stats_shapes,
            grid=(NT,),
            in_specs=[x_spec, w_spec],
            out_specs=(stat_spec, stat_spec),
            compiler_params=cparams,
        )(strips, w_mat)
        conv_flat = None
    else:
        sums, sqs, conv_flat = pl.pallas_call(
            functools.partial(_stats_store_kernel, conv_args=conv_args),
            out_shape=stats_shapes + (jax.ShapeDtypeStruct((M, Cpad), compute_dtype),),
            grid=(NT,),
            in_specs=[x_spec, w_spec],
            out_specs=(stat_spec, stat_spec, conv_spec),
            compiler_params=cparams,
        )(strips, w_mat)

    # ---- tiny cross-tile reduction + folded BN affine (plain JAX, negligible) ----
    total = jnp.sum(sums, axis=0)[0]                      # (Cpad,)
    total_sq = jnp.sum(sqs, axis=0)[0]
    mean = total / M
    var = jnp.maximum(total_sq / M - mean * mean, 0.0)    # guard vs. cancellation
    inv_std = lax.rsqrt(var + eps)
    g = jnp.pad(gamma.astype(jnp.float32), (0, Cpad - Cout))
    b = jnp.pad(beta.astype(jnp.float32), (0, Cpad - Cout))
    scale = (g * inv_std).reshape(1, Cpad)
    bias = (b - mean * g * inv_std).reshape(1, Cpad)

    # ---- pass 2: folded affine + LeakyReLU, un-padded output ----
    out_sds = jax.ShapeDtypeStruct((M, Cout), out_dtype)
    if recompute:
        out_flat = pl.pallas_call(
            functools.partial(_apply_recompute_kernel, conv_args=conv_args,
                              neg_slope=neg_slope, Cout=Cout),
            out_shape=out_sds,
            grid=(NT,),
            in_specs=[x_spec, w_spec, vec_spec, vec_spec],
            out_specs=out_spec,
            compiler_params=cparams,
        )(strips, w_mat, scale, bias)
    else:
        out_flat = pl.pallas_call(
            functools.partial(_apply_stored_kernel, neg_slope=neg_slope, Cout=Cout),
            out_shape=out_sds,
            grid=(NT,),
            in_specs=[conv_spec, vec_spec, vec_spec],
            out_specs=out_spec,
            compiler_params=cparams,
        )(conv_flat, scale, bias)

    out = out_flat.reshape(N, Ho, Wo, Cout)
    if channels_last:
        return out                                        # NHWC (no extra pass)
    return jnp.transpose(out, (0, 3, 1, 2))               # NCHW, to match PyTorch


# ---------------------------------------------------------------------------
# Reference (plain JAX, matches PyTorch semantics with the same bf16 conv inputs)
# ---------------------------------------------------------------------------
def _reference_forward(x_nchw, weight, gamma, beta, *, stride, padding,
                       eps=1e-5, neg_slope=0.2, compute_dtype=jnp.bfloat16):
    conv = lax.conv_general_dilated(
        x_nchw.astype(compute_dtype), weight.astype(compute_dtype),
        window_strides=(stride, stride),
        padding=((padding, padding), (padding, padding)),
        dimension_numbers=("NCHW", "OIHW", "NCHW"),
        preferred_element_type=jnp.float32,
    )
    mean = jnp.mean(conv, axis=(0, 2, 3), keepdims=True)
    var = jnp.mean((conv - mean) ** 2, axis=(0, 2, 3), keepdims=True)
    y = (conv - mean) * lax.rsqrt(var + eps)
    y = y * gamma.reshape(1, -1, 1, 1) + beta.reshape(1, -1, 1, 1)
    return jnp.where(y >= 0, y, neg_slope * y)


if __name__ == "__main__":
    # Downsample(in_channels=4, out_channels=8, kernel_size=4, stride=2, padding=1)
    N, Cin, H, W = 2, 4, 16, 16
    Cout, k, stride, padding = 8, 4, 2, 1

    key = jax.random.PRNGKey(0)
    kx, kw_, kg, kb = jax.random.split(key, 4)
    x = jax.random.normal(kx, (N, Cin, H, W), dtype=jnp.float32)
    weight = 0.1 * jax.random.normal(kw_, (Cout, Cin, k, k), dtype=jnp.float32)
    gamma = 1.0 + 0.1 * jax.random.normal(kg, (Cout,), dtype=jnp.float32)
    beta = 0.1 * jax.random.normal(kb, (Cout,), dtype=jnp.float32)

    ref = _reference_forward(x, weight, gamma, beta, stride=stride, padding=padding)

    # Default path: recompute-conv variant (tiny Cin), f32 NCHW output (PyTorch parity).
    out = downsample_forward(x, weight, gamma, beta, stride=stride, padding=padding)
    out = jax.block_until_ready(out)
    assert out.shape == (N, Cout, H // stride, W // stride)
    assert jnp.allclose(out, ref, atol=5e-3, rtol=5e-3), \
        float(jnp.max(jnp.abs(out - ref)))

    # Store-conv variant with bf16 NHWC output (what a fused NHWC consumer would use).
    out2 = downsample_forward(x, weight, gamma, beta, stride=stride, padding=padding,
                              out_dtype=jnp.bfloat16, channels_last=True, mode="store")
    out2 = jax.block_until_ready(out2)
    ref_nhwc = jnp.transpose(ref, (0, 2, 3, 1))
    assert out2.shape == ref_nhwc.shape
    assert jnp.allclose(out2.astype(jnp.float32), ref_nhwc, atol=3e-2, rtol=3e-2), \
        float(jnp.max(jnp.abs(out2.astype(jnp.float32) - ref_nhwc)))

    print("KERNEL_OK")
</pallas_src>

<mosaic_0001>
module attributes {stable_mosaic.version = 11 : i64} {
  func.func @_stats_kernel(%arg0: i32, %arg1: memref<1x4x9x9x4xbf16, #tpu.memory_space<vmem>>, %arg2: memref<16x4x128xbf16, #tpu.memory_space<vmem>>, %arg3: memref<1x1x128xf32, #tpu.memory_space<vmem>>, %arg4: memref<1x1x128xf32, #tpu.memory_space<vmem>>) attributes {dimension_semantics = [#tpu.dimension_semantics<parallel>], iteration_bounds = array<i64: 2>, scalar_prefetch = 0 : i64, scratch_operands = 0 : i64, tpu.core_type = #tpu.core_type<tc>, window_params = [{transform_indices = @transform_0, window_bounds = array<i64: 1, 4, 9, 9, 4>}, {pipeline_mode = #tpu.pipeline_mode<synchronous>, transform_indices = @transform_1, window_bounds = array<i64: 16, 4, 128>}, {transform_indices = @transform_2, window_bounds = array<i64: 1, 1, 128>}, {transform_indices = @transform_3, window_bounds = array<i64: 1, 1, 128>}]} {
    %cst = arith.constant 0.000000e+00 : f32
    %0 = vector.broadcast %cst : f32 to vector<64x128xf32>
    %c0 = arith.constant 0 : index
    %c0_0 = arith.constant 0 : index
    %c0_1 = arith.constant 0 : index
    %c0_2 = arith.constant 0 : index
    %c0_3 = arith.constant 0 : index
    %1 = vector.load %arg1[%c0, %c0_0, %c0_1, %c0_2, %c0_3] : memref<1x4x9x9x4xbf16, #tpu.memory_space<vmem>>, vector<1x1x8x8x4xbf16>
    %2 = vector.shape_cast %1 : vector<1x1x8x8x4xbf16> to vector<8x8x4xbf16>
    %3 = vector.shape_cast %2 : vector<8x8x4xbf16> to vector<64x4xbf16>
    %c0_4 = arith.constant 0 : index
    %c0_5 = arith.constant 0 : index
    %c0_6 = arith.constant 0 : index
    %4 = vector.load %arg2[%c0_4, %c0_5, %c0_6] : memref<16x4x128xbf16, #tpu.memory_space<vmem>>, vector<1x4x128xbf16>
    %5 = vector.shape_cast %4 : vector<1x4x128xbf16> to vector<4x128xbf16>
    %cst_7 = arith.constant dense<0.000000e+00> : vector<64x128xf32>
    %6 = tpu.matmul %3, %5, %cst_7 {dimension_numbers = #tpu.dot_dimension_numbers<[1], [0], [0], [1], [0, 0, 1, 1], [], []>} : vector<64x4xbf16>, vector<4x128xbf16>, vector<64x128xf32> -> vector<64x128xf32>
    %7 = arith.addf %0, %6 : vector<64x128xf32>
    %c0_8 = arith.constant 0 : index
    %c1 = arith.constant 1 : index
    %c0_9 = arith.constant 0 : index
    %c0_10 = arith.constant 0 : index
    %c0_11 = arith.constant 0 : index
    %8 = vector.load %arg1[%c0_8, %c1, %c0_9, %c0_10, %c0_11] : memref<1x4x9x9x4xbf16, #tpu.memory_space<vmem>>, vector<1x1x8x8x4xbf16>
    %9 = vector.shape_cast %8 : vector<1x1x8x8x4xbf16> to vector<8x8x4xbf16>
    %10 = vector.shape_cast %9 : vector<8x8x4xbf16> to vector<64x4xbf16>
    %c1_12 = arith.constant 1 : index
    %c0_13 = arith.constant 0 : index
    %c0_14 = arith.constant 0 : index
    %11 = vector.load %arg2[%c1_12, %c0_13, %c0_14] : memref<16x4x128xbf16, #tpu.memory_space<vmem>>, vector<1x4x128xbf16>
    %12 = vector.shape_cast %11 : vector<1x4x128xbf16> to vector<4x128xbf16>
    %cst_15 = arith.constant dense<0.000000e+00> : vector<64x128xf32>
    %13 = tpu.matmul %10, %12, %cst_15 {dimension_numbers = #tpu.dot_dimension_numbers<[1], [0], [0], [1], [0, 0, 1, 1], [], []>} : vector<64x4xbf16>, vector<4x128xbf16>, vector<64x128xf32> -> vector<64x128xf32>
    %14 = arith.addf %7, %13 : vector<64x128xf32>
    %c0_16 = arith.constant 0 : index
    %c0_17 = arith.constant 0 : index
    %c0_18 = arith.constant 0 : index
    %c1_19 = arith.constant 1 : index
    %c0_20 = arith.constant 0 : index
    %15 = vector.load %arg1[%c0_16, %c0_17, %c0_18, %c1_19, %c0_20] : memref<1x4x9x9x4xbf16, #tpu.memory_space<vmem>>, vector<1x1x8x8x4xbf16>
    %16 = vector.shape_cast %15 : vector<1x1x8x8x4xbf16> to vector<8x8x4xbf16>
    %17 = vector.shape_cast %16 : vector<8x8x4xbf16> to vector<64x4xbf16>
    %c2 = arith.constant 2 : index
    %c0_21 = arith.constant 0 : index
    %c0_22 = arith.constant 0 : index
    %18 = vector.load %arg2[%c2, %c0_21, %c0_22] : memref<16x4x128xbf16, #tpu.memory_space<vmem>>, vector<1x4x128xbf16>
    %19 = vector.shape_cast %18 : vector<1x4x128xbf16> to vector<4x128xbf16>
    %cst_23 = arith.constant dense<0.000000e+00> : vector<64x128xf32>
    %20 = tpu.matmul %17, %19, %cst_23 {dimension_numbers = #tpu.dot_dimension_numbers<[1], [0], [0], [1], [0, 0, 1, 1], [], []>} : vector<64x4xbf16>, vector<4x128xbf16>, vector<64x128xf32> -> vector<64x128xf32>
    %21 = arith.addf %14, %20 : vector<64x128xf32>
    %c0_24 = arith.constant 0 : index
    %c1_25 = arith.constant 1 : index
    %c0_26 = arith.constant 0 : index
    %c1_27 = arith.constant 1 : index
    %c0_28 = arith.constant 0 : index
    %22 = vector.load %arg1[%c0_24, %c1_25, %c0_26, %c1_27, %c0_28] : memref<1x4x9x9x4xbf16, #tpu.memory_space<vmem>>, vector<1x1x8x8x4xbf16>
    %23 = vector.shape_cast %22 : vector<1x1x8x8x4xbf16> to vector<8x8x4xbf16>
    %24 = vector.shape_cast %23 : vector<8x8x4xbf16> to vector<64x4xbf16>
    %c3 = arith.constant 3 : index
    %c0_29 = arith.constant 0 : index
    %c0_30 = arith.constant 0 : index
    %25 = vector.load %arg2[%c3, %c0_29, %c0_30] : memref<16x4x128xbf16, #tpu.memory_space<vmem>>, vector<1x4x128xbf16>
    %26 = vector.shape_cast %25 : vector<1x4x128xbf16> to vector<4x128xbf16>
    %cst_31 = arith.constant dense<0.000000e+00> : vector<64x128xf32>
    %27 = tpu.matmul %24, %26, %cst_31 {dimension_numbers = #tpu.dot_dimension_numbers<[1], [0], [0], [1], [0, 0, 1, 1], [], []>} : vector<64x4xbf16>, vector<4x128xbf16>, vector<64x128xf32> -> vector<64x128xf32>
    %28 = arith.addf %21, %27 : vector<64x128xf32>
    %c0_32 = arith.constant 0 : index
    %c2_33 = arith.constant 2 : index
    %c0_34 = arith.constant 0 : index
    %c0_35 = arith.constant 0 : index
    %c0_36 = arith.constant 0 : index
    %29 = vector.load %arg1[%c0_32, %c2_33, %c0_34, %c0_35, %c0_36] : memref<1x4x9x9x4xbf16, #tpu.memory_space<vmem>>, vector<1x1x8x8x4xbf16>
    %30 = vector.shape_cast %29 : vector<1x1x8x8x4xbf16> to vector<8x8x4xbf16>
    %31 = vector.shape_cast %30 : vector<8x8x4xbf16> to vector<64x4xbf16>
    %c4 = arith.constant 4 : index
    %c0_37 = arith.constant 0 : index
    %c0_38 = arith.constant 0 : index
    %32 = vector.load %arg2[%c4, %c0_37, %c0_38] : memref<16x4x128xbf16, #tpu.memory_space<vmem>>, vector<1x4x128xbf16>
    %33 = vector.shape_cast %32 : vector<1x4x128xbf16> to vector<4x128xbf16>
    %cst_39 = arith.constant dense<0.000000e+00> : vector<64x128xf32>
    %34 = tpu.matmul %31, %33, %cst_39 {dimension_numbers = #tpu.dot_dimension_numbers<[1], [0], [0], [1], [0, 0, 1, 1], [], []>} : vector<64x4xbf16>, vector<4x128xbf16>, vector<64x128xf32> -> vector<64x128xf32>
    %35 = arith.addf %28, %34 : vector<64x128xf32>
    %c0_40 = arith.constant 0 : index
    %c3_41 = arith.constant 3 : index
    %c0_42 = arith.constant 0 : index
    %c0_43 = arith.constant 0 : index
    %c0_44 = arith.constant 0 : index
    %36 = vector.load %arg1[%c0_40, %c3_41, %c0_42, %c0_43, %c0_44] : memref<1x4x9x9x4xbf16, #tpu.memory_space<vmem>>, vector<1x1x8x8x4xbf16>
    %37 = vector.shape_cast %36 : vector<1x1x8x8x4xbf16> to vector<8x8x4xbf16>
    %38 = vector.shape_cast %37 : vector<8x8x4xbf16> to vector<64x4xbf16>
    %c5 = arith.constant 5 : index
    %c0_45 = arith.constant 0 : index
    %c0_46 = arith.constant 0 : index
    %39 = vector.load %arg2[%c5, %c0_45, %c0_46] : memref<16x4x128xbf16, #tpu.memory_space<vmem>>, vector<1x4x128xbf16>
    %40 = vector.shape_cast %39 : vector<1x4x128xbf16> to vector<4x128xbf16>
    %cst_47 = arith.constant dense<0.000000e+00> : vector<64x128xf32>
    %41 = tpu.matmul %38, %40, %cst_47 {dimension_numbers = #tpu.dot_dimension_numbers<[1], [0], [0], [1], [0, 0, 1, 1], [], []>} : vector<64x4xbf16>, vector<4x128xbf16>, vector<64x128xf32> -> vector<64x128xf32>
    %42 = arith.addf %35, %41 : vector<64x128xf32>
    %c0_48 = arith.constant 0 : index
    %c2_49 = arith.constant 2 : index
    %c0_50 = arith.constant 0 : index
    %c1_51 = arith.constant 1 : index
    %c0_52 = arith.constant 0 : index
    %43 = vector.load %arg1[%c0_48, %c2_49, %c0_50, %c1_51, %c0_52] : memref<1x4x9x9x4xbf16, #tpu.memory_space<vmem>>, vector<1x1x8x8x4xbf16>
    %44 = vector.shape_cast %43 : vector<1x1x8x8x4xbf16> to vector<8x8x4xbf16>
    %45 = vector.shape_cast %44 : vector<8x8x4xbf16> to vector<64x4xbf16>
    %c6 = arith.constant 6 : index
    %c0_53 = arith.constant 0 : index
    %c0_54 = arith.constant 0 : index
    %46 = vector.load %arg2[%c6, %c0_53, %c0_54] : memref<16x4x128xbf16, #tpu.memory_space<vmem>>, vector<1x4x128xbf16>
    %47 = vector.shape_cast %46 : vector<1x4x128xbf16> to vector<4x128xbf16>
    %cst_55 = arith.constant dense<0.000000e+00> : vector<64x128xf32>
    %48 = tpu.matmul %45, %47, %cst_55 {dimension_numbers = #tpu.dot_dimension_numbers<[1], [0], [0], [1], [0, 0, 1, 1], [], []>} : vector<64x4xbf16>, vector<4x128xbf16>, vector<64x128xf32> -> vector<64x128xf32>
    %49 = arith.addf %42, %48 : vector<64x128xf32>
    %c0_56 = arith.constant 0 : index
    %c3_57 = arith.constant 3 : index
    %c0_58 = arith.constant 0 : index
    %c1_59 = arith.constant 1 : index
    %c0_60 = arith.constant 0 : index
    %50 = vector.load %arg1[%c0_56, %c3_57, %c0_58, %c1_59, %c0_60] : memref<1x4x9x9x4xbf16, #tpu.memory_space<vmem>>, vector<1x1x8x8x4xbf16>
    %51 = vector.shape_cast %50 : vector<1x1x8x8x4xbf16> to vector<8x8x4xbf16>
    %52 = vector.shape_cast %51 : vector<8x8x4xbf16> to vector<64x4xbf16>
    %c7 = arith.constant 7 : index
    %c0_61 = arith.constant 0 : index
    %c0_62 = arith.constant 0 : index
    %53 = vector.load %arg2[%c7, %c0_61, %c0_62] : memref<16x4x128xbf16, #tpu.memory_space<vmem>>, vector<1x4x128xbf16>
    %54 = vector.shape_cast %53 : vector<1x4x128xbf16> to vector<4x128xbf16>
    %cst_63 = arith.constant dense<0.000000e+00> : vector<64x128xf32>
    %55 = tpu.matmul %52, %54, %cst_63 {dimension_numbers = #tpu.dot_dimension_numbers<[1], [0], [0], [1], [0, 0, 1, 1], [], []>} : vector<64x4xbf16>, vector<4x128xbf16>, vector<64x128xf32> -> vector<64x128xf32>
    %56 = arith.addf %49, %55 : vector<64x128xf32>
    %c0_64 = arith.constant 0 : index
    %c0_65 = arith.constant 0 : index
    %c1_66 = arith.constant 1 : index
    %c0_67 = arith.constant 0 : index
    %c0_68 = arith.constant 0 : index
    %57 = vector.load %arg1[%c0_64, %c0_65, %c1_66, %c0_67, %c0_68] : memref<1x4x9x9x4xbf16, #tpu.memory_space<vmem>>, vector<1x1x8x8x4xbf16>
    %58 = vector.shape_cast %57 : vector<1x1x8x8x4xbf16> to vector<8x8x4xbf16>
    %59 = vector.shape_cast %58 : vector<8x8x4xbf16> to vector<64x4xbf16>
    %c8 = arith.constant 8 : index
    %c0_69 = arith.constant 0 : index
    %c0_70 = arith.constant 0 : index
    %60 = vector.load %arg2[%c8, %c0_69, %c0_70] : memref<16x4x128xbf16, #tpu.memory_space<vmem>>, vector<1x4x128xbf16>
    %61 = vector.shape_cast %60 : vector<1x4x128xbf16> to vector<4x128xbf16>
    %cst_71 = arith.constant dense<0.000000e+00> : vector<64x128xf32>
    %62 = tpu.matmul %59, %61, %cst_71 {dimension_numbers = #tpu.dot_dimension_numbers<[1], [0], [0], [1], [0, 0, 1, 1], [], []>} : vector<64x4xbf16>, vector<4x128xbf16>, vector<64x128xf32> -> vector<64x128xf32>
    %63 = arith.addf %56, %62 : vector<64x128xf32>
    %c0_72 = arith.constant 0 : index
    %c1_73 = arith.constant 1 : index
    %c1_74 = arith.constant 1 : index
    %c0_75 = arith.constant 0 : index
    %c0_76 = arith.constant 0 : index
    %64 = vector.load %arg1[%c0_72, %c1_73, %c1_74, %c0_75, %c0_76] : memref<1x4x9x9x4xbf16, #tpu.memory_space<vmem>>, vector<1x1x8x8x4xbf16>
    %65 = vector.shape_cast %64 : vector<1x1x8x8x4xbf16> to vector<8x8x4xbf16>
    %66 = vector.shape_cast %65 : vector<8x8x4xbf16> to vector<64x4xbf16>
    %c9 = arith.constant 9 : index
    %c0_77 = arith.constant 0 : index
    %c0_78 = arith.constant 0 : index
    %67 = vector.load %arg2[%c9, %c0_77, %c0_78] : memref<16x4x128xbf16, #tpu.memory_space<vmem>>, vector<1x4x128xbf16>
    %68 = vector.shape_cast %67 : vector<1x4x128xbf16> to vector<4x128xbf16>
    %cst_79 = arith.constant dense<0.000000e+00> : vector<64x128xf32>
    %69 = tpu.matmul %66, %68, %cst_79 {dimension_numbers = #tpu.dot_dimension_numbers<[1], [0], [0], [1], [0, 0, 1, 1], [], []>} : vector<64x4xbf16>, vector<4x128xbf16>, vector<64x128xf32> -> vector<64x128xf32>
    %70 = arith.addf %63, %69 : vector<64x128xf32>
    %c0_80 = arith.constant 0 : index
    %c0_81 = arith.constant 0 : index
    %c1_82 = arith.constant 1 : index
    %c1_83 = arith.constant 1 : index
    %c0_84 = arith.constant 0 : index
    %71 = vector.load %arg1[%c0_80, %c0_81, %c1_82, %c1_83, %c0_84] : memref<1x4x9x9x4xbf16, #tpu.memory_space<vmem>>, vector<1x1x8x8x4xbf16>
    %72 = vector.shape_cast %71 : vector<1x1x8x8x4xbf16> to vector<8x8x4xbf16>
    %73 = vector.shape_cast %72 : vector<8x8x4xbf16> to vector<64x4xbf16>
    %c10 = arith.constant 10 : index
    %c0_85 = arith.constant 0 : index
    %c0_86 = arith.constant 0 : index
    %74 = vector.load %arg2[%c10, %c0_85, %c0_86] : memref<16x4x128xbf16, #tpu.memory_space<vmem>>, vector<1x4x128xbf16>
    %75 = vector.shape_cast %74 : vector<1x4x128xbf16> to vector<4x128xbf16>
    %cst_87 = arith.constant dense<0.000000e+00> : vector<64x128xf32>
    %76 = tpu.matmul %73, %75, %cst_87 {dimension_numbers = #tpu.dot_dimension_numbers<[1], [0], [0], [1], [0, 0, 1, 1], [], []>} : vector<64x4xbf16>, vector<4x128xbf16>, vector<64x128xf32> -> vector<64x128xf32>
    %77 = arith.addf %70, %76 : vector<64x128xf32>
    %c0_88 = arith.constant 0 : index
    %c1_89 = arith.constant 1 : index
    %c1_90 = arith.constant 1 : index
    %c1_91 = arith.constant 1 : index
    %c0_92 = arith.constant 0 : index
    %78 = vector.load %arg1[%c0_88, %c1_89, %c1_90, %c1_91, %c0_92] : memref<1x4x9x9x4xbf16, #tpu.memory_space<vmem>>, vector<1x1x8x8x4xbf16>
    %79 = vector.shape_cast %78 : vector<1x1x8x8x4xbf16> to vector<8x8x4xbf16>
    %80 = vector.shape_cast %79 : vector<8x8x4xbf16> to vector<64x4xbf16>
    %c11 = arith.constant 11 : index
    %c0_93 = arith.constant 0 : index
    %c0_94 = arith.constant 0 : index
    %81 = vector.load %arg2[%c11, %c0_93, %c0_94] : memref<16x4x128xbf16, #tpu.memory_space<vmem>>, vector<1x4x128xbf16>
    %82 = vector.shape_cast %81 : vector<1x4x128xbf16> to vector<4x128xbf16>
    %cst_95 = arith.constant dense<0.000000e+00> : vector<64x128xf32>
    %83 = tpu.matmul %80, %82, %cst_95 {dimension_numbers = #tpu.dot_dimension_numbers<[1], [0], [0], [1], [0, 0, 1, 1], [], []>} : vector<64x4xbf16>, vector<4x128xbf16>, vector<64x128xf32> -> vector<64x128xf32>
    %84 = arith.addf %77, %83 : vector<64x128xf32>
    %c0_96 = arith.constant 0 : index
    %c2_97 = arith.constant 2 : index
    %c1_98 = arith.constant 1 : index
    %c0_99 = arith.constant 0 : index
    %c0_100 = arith.constant 0 : index
    %85 = vector.load %arg1[%c0_96, %c2_97, %c1_98, %c0_99, %c0_100] : memref<1x4x9x9x4xbf16, #tpu.memory_space<vmem>>, vector<1x1x8x8x4xbf16>
    %86 = vector.shape_cast %85 : vector<1x1x8x8x4xbf16> to vector<8x8x4xbf16>
    %87 = vector.shape_cast %86 : vector<8x8x4xbf16> to vector<64x4xbf16>
    %c12 = arith.constant 12 : index
    %c0_101 = arith.constant 0 : index
    %c0_102 = arith.constant 0 : index
    %88 = vector.load %arg2[%c12, %c0_101, %c0_102] : memref<16x4x128xbf16, #tpu.memory_space<vmem>>, vector<1x4x128xbf16>
    %89 = vector.shape_cast %88 : vector<1x4x128xbf16> to vector<4x128xbf16>
    %cst_103 = arith.constant dense<0.000000e+00> : vector<64x128xf32>
    %90 = tpu.matmul %87, %89, %cst_103 {dimension_numbers = #tpu.dot_dimension_numbers<[1], [0], [0], [1], [0, 0, 1, 1], [], []>} : vector<64x4xbf16>, vector<4x128xbf16>, vector<64x128xf32> -> vector<64x128xf32>
    %91 = arith.addf %84, %90 : vector<64x128xf32>
    %c0_104 = arith.constant 0 : index
    %c3_105 = arith.constant 3 : index
    %c1_106 = arith.constant 1 : index
    %c0_107 = arith.constant 0 : index
    %c0_108 = arith.constant 0 : index
    %92 = vector.load %arg1[%c0_104, %c3_105, %c1_106, %c0_107, %c0_108] : memref<1x4x9x9x4xbf16, #tpu.memory_space<vmem>>, vector<1x1x8x8x4xbf16>
    %93 = vector.shape_cast %92 : vector<1x1x8x8x4xbf16> to vector<8x8x4xbf16>
    %94 = vector.shape_cast %93 : vector<8x8x4xbf16> to vector<64x4xbf16>
    %c13 = arith.constant 13 : index
    %c0_109 = arith.constant 0 : index
    %c0_110 = arith.constant 0 : index
    %95 = vector.load %arg2[%c13, %c0_109, %c0_110] : memref<16x4x128xbf16, #tpu.memory_space<vmem>>, vector<1x4x128xbf16>
    %96 = vector.shape_cast %95 : vector<1x4x128xbf16> to vector<4x128xbf16>
    %cst_111 = arith.constant dense<0.000000e+00> : vector<64x128xf32>
    %97 = tpu.matmul %94, %96, %cst_111 {dimension_numbers = #tpu.dot_dimension_numbers<[1], [0], [0], [1], [0, 0, 1, 1], [], []>} : vector<64x4xbf16>, vector<4x128xbf16>, vector<64x128xf32> -> vector<64x128xf32>
    %98 = arith.addf %91, %97 : vector<64x128xf32>
    %c0_112 = arith.constant 0 : index
    %c2_113 = arith.constant 2 : index
    %c1_114 = arith.constant 1 : index
    %c1_115 = arith.constant 1 : index
    %c0_116 = arith.constant 0 : index
    %99 = vector.load %arg1[%c0_112, %c2_113, %c1_114, %c1_115, %c0_116] : memref<1x4x9x9x4xbf16, #tpu.memory_space<vmem>>, vector<1x1x8x8x4xbf16>
    %100 = vector.shape_cast %99 : vector<1x1x8x8x4xbf16> to vector<8x8x4xbf16>
    %101 = vector.shape_cast %100 : vector<8x8x4xbf16> to vector<64x4xbf16>
    %c14 = arith.constant 14 : index
    %c0_117 = arith.constant 0 : index
    %c0_118 = arith.constant 0 : index
    %102 = vector.load %arg2[%c14, %c0_117, %c0_118] : memref<16x4x128xbf16, #tpu.memory_space<vmem>>, vector<1x4x128xbf16>
    %103 = vector.shape_cast %102 : vector<1x4x128xbf16> to vector<4x128xbf16>
    %cst_119 = arith.constant dense<0.000000e+00> : vector<64x128xf32>
    %104 = tpu.matmul %101, %103, %cst_119 {dimension_numbers = #tpu.dot_dimension_numbers<[1], [0], [0], [1], [0, 0, 1, 1], [], []>} : vector<64x4xbf16>, vector<4x128xbf16>, vector<64x128xf32> -> vector<64x128xf32>
    %105 = arith.addf %98, %104 : vector<64x128xf32>
    %c0_120 = arith.constant 0 : index
    %c3_121 = arith.constant 3 : index
    %c1_122 = arith.constant 1 : index
    %c1_123 = arith.constant 1 : index
    %c0_124 = arith.constant 0 : index
    %106 = vector.load %arg1[%c0_120, %c3_121, %c1_122, %c1_123, %c0_124] : memref<1x4x9x9x4xbf16, #tpu.memory_space<vmem>>, vector<1x1x8x8x4xbf16>
    %107 = vector.shape_cast %106 : vector<1x1x8x8x4xbf16> to vector<8x8x4xbf16>
    %108 = vector.shape_cast %107 : vector<8x8x4xbf16> to vector<64x4xbf16>
    %c15 = arith.constant 15 : index
    %c0_125 = arith.constant 0 : index
    %c0_126 = arith.constant 0 : index
    %109 = vector.load %arg2[%c15, %c0_125, %c0_126] : memref<16x4x128xbf16, #tpu.memory_space<vmem>>, vector<1x4x128xbf16>
    %110 = vector.shape_cast %109 : vector<1x4x128xbf16> to vector<4x128xbf16>
    %cst_127 = arith.constant dense<0.000000e+00> : vector<64x128xf32>
    %111 = tpu.matmul %108, %110, %cst_127 {dimension_numbers = #tpu.dot_dimension_numbers<[1], [0], [0], [1], [0, 0, 1, 1], [], []>} : vector<64x4xbf16>, vector<4x128xbf16>, vector<64x128xf32> -> vector<64x128xf32>
    %112 = arith.addf %105, %111 : vector<64x128xf32>
    %cst_128 = arith.constant dense<0.000000e+00> : vector<128xf32>
    %113 = vector.multi_reduction <add>, %112, %cst_128 [0] : vector<64x128xf32> to vector<128xf32>
    %114 = vector.shape_cast %113 : vector<128xf32> to vector<1x128xf32>
    %c0_129 = arith.constant 0 : index
    %c0_130 = arith.constant 0 : index
    %c0_131 = arith.constant 0 : index
    %115 = vector.load %arg3[%c0_129, %c0_130, %c0_131] : memref<1x1x128xf32, #tpu.memory_space<vmem>>, vector<1x1x128xf32>
    %116 = vector.shape_cast %115 : vector<1x1x128xf32> to vector<1x128xf32>
    %117 = vector.shape_cast %114 : vector<1x128xf32> to vector<1x1x128xf32>
    tpu.vector_store %arg3[%c0_129, %c0_130, %c0_131], %117 {strides = array<i32>} : memref<1x1x128xf32, #tpu.memory_space<vmem>>, vector<1x1x128xf32>,
    %118 = arith.mulf %112, %112 : vector<64x128xf32>
    %cst_132 = arith.constant dense<0.000000e+00> : vector<128xf32>
    %119 = vector.multi_reduction <add>, %118, %cst_132 [0] : vector<64x128xf32> to vector<128xf32>
    %120 = vector.shape_cast %119 : vector<128xf32> to vector<1x128xf32>
    %c0_133 = arith.constant 0 : index
    %c0_134 = arith.constant 0 : index
    %c0_135 = arith.constant 0 : index
    %121 = vector.load %arg4[%c0_133, %c0_134, %c0_135] : memref<1x1x128xf32, #tpu.memory_space<vmem>>, vector<1x1x128xf32>
    %122 = vector.shape_cast %121 : vector<1x1x128xf32> to vector<1x128xf32>
    %123 = vector.shape_cast %120 : vector<1x128xf32> to vector<1x1x128xf32>
    tpu.vector_store %arg4[%c0_133, %c0_134, %c0_135], %123 {strides = array<i32>} : memref<1x1x128xf32, #tpu.memory_space<vmem>>, vector<1x1x128xf32>,
    return
  }
  func.func @transform_0(%arg0: i32) -> (i32, i32, i32, i32, i32) {
    %c0_i32 = arith.constant 0 : i32
    %c0_i32_0 = arith.constant 0 : i32
    %c0_i32_1 = arith.constant 0 : i32
    %c0_i32_2 = arith.constant 0 : i32
    %c0_i32_3 = arith.constant 0 : i32
    return %arg0, %c0_i32, %c0_i32_0, %c0_i32_1, %c0_i32_2 : i32, i32, i32, i32, i32
  }
  func.func @transform_1(%arg0: i32) -> (i32, i32, i32) {
    %c0_i32 = arith.constant 0 : i32
    %c0_i32_0 = arith.constant 0 : i32
    %c0_i32_1 = arith.constant 0 : i32
    %c0_i32_2 = arith.constant 0 : i32
    return %c0_i32, %c0_i32_0, %c0_i32_1 : i32, i32, i32
  }
  func.func @transform_2(%arg0: i32) -> (i32, i32, i32) {
    %c0_i32 = arith.constant 0 : i32
    %c0_i32_0 = arith.constant 0 : i32
    %c0_i32_1 = arith.constant 0 : i32
    return %arg0, %c0_i32, %c0_i32_0 : i32, i32, i32
  }
  func.func @transform_3(%arg0: i32) -> (i32, i32, i32) {
    %c0_i32 = arith.constant 0 : i32
    %c0_i32_0 = arith.constant 0 : i32
    %c0_i32_1 = arith.constant 0 : i32
    return %arg0, %c0_i32, %c0_i32_0 : i32, i32, i32
  }
}

</mosaic_0001>

<bundles_post_ra>
// kernel: tpu_custom_call.1
= control target key start
LH: loop header
LB: loop body
LE: loop exit
PB: predicated region body
PF: predicated region fallthrough
CT: control target
= control target key end

     0   :  { %9 = vsyncpa [#allocation3], 0  ;;  %s3787_s0 = inlined_call_operand.vmem [shape: bf16[2,4,9,9,4], index: 0, kind: input, shape index: {}]   ;;  %s3788_s1 = inlined_call_operand.vmem [shape: bf16[16,4,128], index: 1, kind: input, shape index: {}]   ;;  %s3789_s2 = inlined_call_operand.hbm [shape: f32[2,1,128], index: 2, kind: output, shape index: {0}]   ;;  %s3790_s3 = inlined_call_operand.hbm [shape: f32[2,1,128], index: 3, kind: output, shape index: {1}]  }
   0x1   :  { %11 = vsyncpa [#allocation3 + $0x1], 0 }
   0x2   :  { %12 = vsyncpa [#allocation5], 0 }
   0x3   :  { %14 = vsyncpa [#allocation5 + $0x1], 0  ;;  %s3106_s12 = smov 0   ;;  %s3108_s13 = smov 0  }
   0x4   :  { %s3110_s14 = smov 0   ;;  %s3112_s15 = smov 0  }
   0x5 LB: > { %s3127_s16 = sadd.s32 4294967295, %s3084_s15   ;;  %s2531_s17 = sadd.s32 4294967294, %s3084_s15   ;;  %s3084_s15 = sphi %s3112_s15, %s3798_s15   ;;  %s3080_s14 = sphi %s3110_s14, %s3797_s14   ;;  %s3076_s13 = sphi %s3108_s13, %s3796_s13   ;;  %s3072_s12 = sphi %s3106_s12, %s3795_s12  }
   0x6   : > { %s3131_s18 = sadd.s32 1, %s3084_s15   ;;  %s74_s19 = sadd.s32 1, %s3080_s14 }
   0x7   : > { %s71_s20 = ssub.s32 %s3084_s15, %s3131_s18  ;;  %p84_p0 = scmp.ne.s32.totalorder %s3080_s14, %s3076_s13 }
   0x8   : > { %p72_p1 = scmp.eq.s32.totalorder %s71_s20, 0  ;;  %p85_p2 = scmp.eq.s32.totalorder %s3127_s16, 1 }
   0x9   : > { %p90_p3 = scmp.ne.s32.totalorder %s3076_s13, %s3072_s12  ;;  %p91_p4 = scmp.eq.s32.totalorder %s2531_s17, 1 }
   0xa   : > { %s3142_s21 = scalar_select %p72_p1, %s3080_s14, %s74_s19  }
   0xb   : > { %p3144_p5 = por %p85_p2, %p84_p0  ;;  %p3148_p6 = por %p91_p4, %p90_p3 }
   0xc   : > { %p2534_p7 = scmp.ge.s32.totalorder %s3084_s15, 1  ;;  %p146_p8 = scmp.lt.s32.totalorder %s3084_s15, 3 }
   0xe   : > { %p147_p9 = pnand %p2534_p7, %p146_p8 }
   0xf   : > { %p173_p10 = scmp.lt.s32.totalorder (!%p147_p9), %s3127_s16, 1  ;;  %s3718_s25 = sand.u32 (!%p147_p9), 1, %s3076_s13  }
  0x10   : > { %150 = sbr.rel (%p147_p9) target bundleno = 457 (0x1c9), region = 28  ;;  %s2431_s28 = scalar_lea.hbm (!%p147_p9), %s3789_s2, %s3127_s16 }
  0x11   : > { %s2444_s4 = scalar_lea.hbm (!%p147_p9), %s3790_s3, %s3127_s16  ;;  %s166_s5 = scalar_lea.vmem (!%p147_p9), [#allocation2], %s3718_s25 }
  0x12   : > { %s3729_s6 = sshll.u32 (!%p147_p9), %s166_s5, 4  ;;  %s3731_s7 = sshll.u32 (!%p147_p9), %s2431_s28, 4  ;;  %s2434_s6 = int_to_ptr.vmem [resolvable:$true] %s3729_s6  ;;  %s2436_s7 = int_to_ptr.hbm [resolvable:$true] %s3731_s7 }
  0x13   : > { %s3736_s10 = sshll.u32 (!%p147_p9), %s2444_s4, 4  ;;  %s3004_s11 = sshra.s32 (!%p147_p9), %s2436_s7, 4  ;;  %s2449_s10 = int_to_ptr.hbm [resolvable:$true] %s3736_s10  ;;  %s3005_s11 = int_to_ptr.hbm [resolvable:$true] %s3004_s11 }
  0x14   : > { %s3006_s17 = scalar_lea.hbm (!%p147_p9), %s3005_s11, 1  ;;  %s3010_s24 = scalar_lea.hbm (!%p147_p9), %s3789_s2, 2 }
  0x15   : > { %v2544_v0 = vld [vmem:[%s3788_s1 + $0x2] sm:$0x3]  ;;  %vm232_vm0 = vcmask 1041408   ;;  %v187_v1 = vld [vmem:[%s3788_s1] sm:$0x3]  ;;  %s174_s30 = scalar_select %p173_p10, %s3127_s16, 1 }
  0x16   : > { %v234_v2 = vsel %vm232_vm0, %v2544_v0, 0  ;;  %v298_v3 = vsel %vm232_vm0, %v187_v1, 0  ;;  %v2585_v4 = vld [vmem:[%s3788_s1 + $0x4] sm:$0x3]  ;;  %v2606_v6 = vld [vmem:[%s3788_s1 + $0x6] sm:$0x3]  ;;  %p3007_p11 = scmp.ne.s32.totalorder %s3005_s11, %s3006_s17  ;;  %p3011_p0 = scmp.lt.s32.totalorder %s3005_s11, %s3789_s2 }
  0x17   : > { %243 = vmatpush.bf16.msra.mxu0 %v234_v2  ;;  %307 = vmatpush.bf16.msra.mxu1 %v298_v3  ;;  %v487_v5 = vsel %vm232_vm0, %v2585_v4, 0  ;;  %v681_v7 = vsel %vm232_vm0, %v2606_v6, 0  ;;  %v2685_v8 = vld [vmem:[%s3788_s1 + $0xc] sm:$0x3]  ;;  %s2945_s8 = smul.u32 288, %s174_s30  ;;  %vm219_vm1 = vcmask 31744   ;;  %p3012_p1 = scmp.lt.s32.totalorder %s3010_s24, %s3006_s17 }
  0x18   : > { %496 = vmatpush.bf16.msra.mxu2 %v487_v5  ;;  %690 = vmatpush.bf16.msra.mxu3 %v681_v7  ;;  %v1041_v9 = vsel %vm232_vm0, %v2685_v8, 0  ;;  %v2619_v10 = vld [vmem:[%s3788_s1 + $0x8] sm:$0x3]  ;;  %v2706_v11 = vld [vmem:[%s3788_s1 + $0xe] sm:$0x3]  ;;  %s2419_s16 = scalar_lea.sflag [#allocation3], %s3718_s25  ;;  %p3008_p12 = pnand %p3007_p11, %p3144_p5 }
  0x19   : > { %v764_v12 = vsel %vm232_vm0, %v2619_v10, 0  ;;  %v1235_v13 = vsel %vm232_vm0, %v2706_v11, 0  ;;  %v2648_v14 = vld [vmem:[%s3788_s1 + $0xa] sm:$0x3]  ;;  %s3190_s26 = scalar_lea.vmem %s3787_s0, %s2945_s8  ;;  %vm345_vm2 = vsmask.f32 3328  ;;  %p3013_p2 = por %p3012_p1, %p3011_p0 }
  0x1a   : > { %vm346_vm3 = vsmask.f32 7440  ;;  %v847_v15 = vsel %vm232_vm0, %v2648_v14, 0  ;;  %v2547_v16 = vld [vmem:[%s3190_s26 + $0x48] sm:$0xf]  ;;  %s172_s8 = scalar_lea.vmem [#allocation4], %s3718_s25  ;;  %p3009_p13 = pneg %p3008_p12 }
  0x1b   : > { %773 = vmatpush.bf16.msrb.mxu0 %v764_v12  ;;  %v2917_v17 = vld [vmem:[%s3190_s26 + $0x4c] sm:$0xf0]  ;;  %v2567_v18 = vld [vmem:[%s3190_s26] sm:$0xf]  ;;  %856 = vmatpush.bf16.msrb.mxu1 %v847_v15  ;;  %v2913_v20 = vld [vmem:[%s3190_s26 + $0x4] sm:$0xf0] }
  0x1c   : > { %1050 = vmatpush.bf16.msrb.mxu2 %v1041_v9  ;;  %1244 = vmatpush.bf16.msrb.mxu3 %v1235_v13  ;;  %v2548_v19 = vor.u32 %v2917_v17, %v2547_v16  ;;  %v329_v21 = vld [vmem:[%s3190_s26] sm:$0xf]  ;;  %v330_v22 = vld [vmem:[%s3190_s26 + $0x4] sm:$0x1]  ;;  %v2568_v23 = vor.u32 %v2913_v20, %v2567_v18  ;;  %v331_v24 = vld [vmem:[%s3190_s26 + $0x8] sm:$0xf]  ;;  %p3014_p3 = pnand %p3013_p2, %p3009_p13 }
  0x1d   : > { %v332_v25 = vld [vmem:[%s3190_s26 + $0xc] sm:$0x1]  ;;  %v349_v26 = vshrl.u32 %v329_v21, 16  ;;  %v352_v27 = vshll.u32 %v329_v21, 16  ;;  %v358_v28 = vshll.u32 %v330_v22, 16  ;;  %v363_v29 = vshrl.u32 %v331_v24, 16  ;;  %vm3212_vm4 = vmor %vm345_vm2, %vm346_vm3 }
  0x1e   : > { %2561 = vmatmul.msk.bf16.vlgmr.msra.gmra.mxu0 %vm219_vm1, %v2548_v19  ;;  %v366_v30 = vshll.u32 %v331_v24, 16  ;;  %v372_v31 = vshll.u32 %v332_v25, 16  ;;  %v2590_v32 = vld [vmem:[%s3190_s26 + $0x48] sm:$0xf]  ;;  %2581 = vmatmul.msk.bf16.vlgmr.msra.gmra.mxu1 %vm219_vm1, %v2568_v23  ;;  %v2591_v35 = vld [vmem:[%s3190_s26 + $0x4c] sm:$0x1] }
  0x1f   : > { %v351_v33 = vrot.slane %v349_v26, 4  ;;  %v354_v34 = vrot.slane %v352_v27, 5  ;;  %v2592_v36 = vld [vmem:[%s3190_s26 + $0x50] sm:$0xf]  ;;  %v360_v37 = vrot.slane %v358_v28, 5  ;;  %v365_v38 = vrot.slane %v363_v29, 4 }
  0x20   : > { %v368_v39 = vrot.slane %v366_v30, 5  ;;  %v374_v40 = vrot.slane %v372_v31, 5  ;;  %v2593_v41 = vld [vmem:[%s3190_s26 + $0x54] sm:$0x1]  ;;  %v543_v43 = vshrl.u32 %v2590_v32, 16  ;;  %v546_v44 = vshll.u32 %v2590_v32, 16 }
  0x21   : > { %v355_v42 = vor.u32 %v354_v34, %v351_v33  ;;  %v552_v45 = vshll.u32 %v2591_v35, 16  ;;  %v3208_v46 = vld [vmem:[%s3190_s26 + $0x58] sm:$0xf]  ;;  %v557_v49 = vshrl.u32 %v2592_v36, 16  ;;  %v560_v50 = vshll.u32 %v2592_v36, 16  ;;  %s3734_s9 = sshll.u32 %s172_s8, 4  ;;  %s2447_s9 = int_to_ptr.vmem [resolvable:$true] %s3734_s9 }
  0x22   : > { %v369_v48 = vor.u32 %v368_v39, %v365_v38  ;;  %v566_v51 = vshll.u32 %v2593_v41, 16  ;;  %v2918_v52 = vld [vmem:[%s3190_s26 + $0x5c] sm:$0xf0]  ;;  %v545_v54 = vrot.slane %v543_v43, 4  ;;  %v548_v55 = vrot.slane %v546_v44, 5 }
  0x23   : > { %v356_v53 = vrot.slane %v355_v42, 4  ;;  %v554_v56 = vrot.slane %v552_v45, 5  ;;  %v2571_v57 = vld [vmem:[%s3190_s26 + $0x10] sm:$0xf]  ;;  %v559_v59 = vrot.slane %v557_v49, 4  ;;  %v562_v60 = vrot.slane %v560_v50, 5 }
  0x24   : > { %v370_v58 = vrot.slane %v369_v48, 4  ;;  %v568_v61 = vrot.slane %v566_v51, 5  ;;  %v2914_v62 = vld [vmem:[%s3190_s26 + $0x14] sm:$0xf0]  ;;  %v549_v0 = vor.u32 %v548_v55, %v545_v54  ;;  %v2552_v1 = vor.u32 %v2918_v52, %v3208_v46  ;;  %v333_v3 = vld [vmem:[%s3190_s26 + $0x10] sm:$0xf] }
  0x25   : > { %v361_v63 = vsel %vm3212_vm4, %v356_v53, %v360_v37  ;;  %v2572_v2 = vor.u32 %v2914_v62, %v2571_v57  ;;  %v334_v4 = vld [vmem:[%s3190_s26 + $0x14] sm:$0x1]  ;;  %v335_v5 = vld [vmem:[%s3190_s26 + $0x18] sm:$0xf]  ;;  %v563_v8 = vor.u32 %v562_v60, %v559_v59  ;;  %v377_v9 = vshrl.u32 %v333_v3, 16 }
  0x26   : > { %v375_v6 = vsel %vm3212_vm4, %v370_v58, %v374_v40  ;;  %v462_v7 = vunpack.c.l.b16 %v361_v63  ;;  %v550_v11 = vrot.slane %v549_v0, 4  ;;  %v336_v12 = vld [vmem:[%s3190_s26 + $0x1c] sm:$0x1]  ;;  %v380_v13 = vshll.u32 %v333_v3, 16  ;;  %v2594_v19 = vld [vmem:[%s3190_s26 + $0x58] sm:$0xf] }
  0x27   : > { %v463_v10 = vunpack.c.l.b16 %v375_v6  ;;  %v386_v14 = vshll.u32 %v334_v4, 16  ;;  %v564_v15 = vrot.slane %v563_v8, 4  ;;  %v379_v16 = vrot.slane %v377_v9, 4  ;;  %v2595_v24 = vld [vmem:[%s3190_s26 + $0x5c] sm:$0x1] }
  0x28   : > { %v391_v17 = vshrl.u32 %v335_v5, 16  ;;  %v394_v18 = vshll.u32 %v335_v5, 16  ;;  %v555_v21 = vsel %vm3212_vm4, %v550_v11, %v554_v56  ;;  %v382_v22 = vrot.slane %v380_v13, 5  ;;  %v2596_v25 = vld [vmem:[%s3190_s26 + $0x60] sm:$0xf] }
  0x29   : > { %v470_v20 = vpack.c.b16 %v463_v10, %v462_v7  ;;  %v388_v23 = vrot.slane %v386_v14, 5  ;;  %v569_v26 = vsel %vm3212_vm4, %v564_v15, %v568_v61  ;;  %v656_v27 = vunpack.c.l.b16 %v555_v21  ;;  %v2597_v35 = vld [vmem:[%s3190_s26 + $0x64] sm:$0x1]  ;;  %v337_v45 = vld [vmem:[%s3190_s26 + $0x20] sm:$0xf] }
  0x2a   : > { %v393_v28 = vrot.slane %v391_v17, 4  ;;  %v396_v29 = vrot.slane %v394_v18, 5  ;;  %v657_v30 = vunpack.c.l.b16 %v569_v26  ;;  %v383_v31 = vor.u32 %v382_v22, %v379_v16  ;;  %v339_v51 = vld [vmem:[%s3190_s26 + $0x28] sm:$0xf]  ;;  %v338_v58 = vld [vmem:[%s3190_s26 + $0x24] sm:$0x1] }
  0x2b   : > { %2586 = vmatmul.msk.bf16.vlgmr.msra.gmra.mxu2 %vm219_vm1, %v470_v20  ;;  %v400_v32 = vshll.u32 %v336_v12, 16  ;;  %v571_v33 = vshrl.u32 %v2594_v19, 16  ;;  %v574_v36 = vshll.u32 %v2594_v19, 16  ;;  %v580_v37 = vshll.u32 %v2595_v24, 16  ;;  %v340_v61 = vld [vmem:[%s3190_s26 + $0x2c] sm:$0x1] }
  0x2c   : > { %v397_v34 = vor.u32 %v396_v29, %v393_v28  ;;  %v585_v38 = vshrl.u32 %v2596_v25, 16  ;;  %v664_v39 = vpack.c.b16 %v657_v30, %v656_v27  ;;  %v384_v40 = vrot.slane %v383_v31, 4  ;;  %v2598_v4 = vld [vmem:[%s3190_s26 + $0x68] sm:$0xf]  ;;  %v2600_v8 = vld [vmem:[%s3190_s26 + $0x70] sm:$0xf] }
  0x2d   : > { %v402_v41 = vrot.slane %v400_v32, 5  ;;  %v573_v42 = vrot.slane %v571_v33, 4  ;;  %v576_v44 = vrot.slane %v574_v36, 5  ;;  %v588_v49 = vshll.u32 %v2596_v25, 16  ;;  %v2555_v11 = vld [vmem:[%s3190_s26 + $0x68] sm:$0xf] }
  0x2e   : > { %2562 = vmatmul.msk.bf16.gmra.mxu0 %vm219_vm1, %v2552_v1  ;;  %v398_v43 = vrot.slane %v397_v34, 4  ;;  %2607 = vmatmul.msk.bf16.vlgmr.msra.gmra.mxu3 %vm219_vm1, %v664_v39  ;;  %v389_v46 = vsel %vm3212_vm4, %v384_v40, %v388_v23  ;;  %v587_v48 = vrot.slane %v585_v38, 4  ;;  %v594_v50 = vshll.u32 %v2597_v35, 16  ;;  %v2599_v14 = vld [vmem:[%s3190_s26 + $0x6c] sm:$0x1] }
  0x2f   : > { %2582 = vmatmul.msk.bf16.gmra.mxu1 %vm219_vm1, %v2572_v2  ;;  %v577_v53 = vor.u32 %v576_v44, %v573_v42  ;;  %v582_v54 = vrot.slane %v580_v37, 5  ;;  %v464_v55 = vunpack.c.l.b16 %v389_v46  ;;  %v590_v57 = vrot.slane %v588_v49, 5  ;;  %v2919_v15 = vld [vmem:[%s3190_s26 + $0x6c] sm:$0xf0]  ;;  %v2575_v22 = vld [vmem:[%s3190_s26 + $0x20] sm:$0xf] }
  0x30   : > { %v403_v52 = vsel %vm3212_vm4, %v398_v43, %v402_v41  ;;  %v405_v59 = vshrl.u32 %v337_v45, 16  ;;  %v408_v62 = vshll.u32 %v337_v45, 16  ;;  %v419_v63 = vshrl.u32 %v339_v51, 16  ;;  %v2915_v23 = vld [vmem:[%s3190_s26 + $0x24] sm:$0xf0] }
  0x31   : > { %v465_v56 = vunpack.c.l.b16 %v403_v52  ;;  %v578_v60 = vrot.slane %v577_v53, 4  ;;  %v591_v0 = vor.u32 %v590_v57, %v587_v48  ;;  %v596_v1 = vrot.slane %v594_v50, 5  ;;  %v2601_v27 = vld [vmem:[%s3190_s26 + $0x74] sm:$0x1]  ;;  %v341_v39 = vld [vmem:[%s3190_s26 + $0x30] sm:$0xf] }
  0x32   : > { %v407_v2 = vrot.slane %v405_v59, 4  ;;  %v422_v3 = vshll.u32 %v339_v51, 16  ;;  %v410_v6 = vrot.slane %v408_v62, 5  ;;  %v421_v7 = vrot.slane %v419_v63, 4  ;;  %v343_v44 = vld [vmem:[%s3190_s26 + $0x38] sm:$0xf] }
  0x33   : > { %v583_v5 = vsel %vm3212_vm4, %v578_v60, %v582_v54  ;;  %v471_v9 = vpack.c.b16 %v465_v56, %v464_v55  ;;  %v592_v10 = vrot.slane %v591_v0, 4  ;;  %v414_v12 = vshll.u32 %v338_v58, 16  ;;  %v2602_v55 = vld [vmem:[%s3190_s26 + $0x78] sm:$0xf]  ;;  %v342_v60 = vld [vmem:[%s3190_s26 + $0x34] sm:$0x1] }
  0x34   : > { %v424_v13 = vrot.slane %v422_v3, 5  ;;  %v411_v16 = vor.u32 %v410_v6, %v407_v2  ;;  %v428_v17 = vshll.u32 %v340_v61, 16  ;;  %v599_v18 = vshrl.u32 %v2598_v4, 16  ;;  %v2604_v63 = vld [vmem:[%s3190_s26 + $0x80] sm:$0xf] }
  0x35   : > { %v602_v19 = vshll.u32 %v2598_v4, 16  ;;  %v597_v20 = vsel %vm3212_vm4, %v592_v10, %v596_v1  ;;  %v658_v21 = vunpack.c.l.b16 %v583_v5  ;;  %v613_v25 = vshrl.u32 %v2600_v8, 16  ;;  %v344_v4 = vld [vmem:[%s3190_s26 + $0x3c] sm:$0x1] }
  0x36   : > { %v425_v24 = vor.u32 %v424_v13, %v421_v7  ;;  %v659_v26 = vunpack.c.l.b16 %v597_v20  ;;  %v601_v28 = vrot.slane %v599_v18, 4  ;;  %v608_v30 = vshll.u32 %v2599_v14, 16  ;;  %v2920_v20 = vld [vmem:[%s3190_s26 + $0x7c] sm:$0xf0] }
  0x37   : > { %v604_v29 = vrot.slane %v602_v19, 5  ;;  %v412_v31 = vrot.slane %v411_v16, 4  ;;  %v416_v32 = vrot.slane %v414_v12, 5  ;;  %v615_v33 = vrot.slane %v613_v25, 4 }
  0x38   : > { %v616_v34 = vshll.u32 %v2600_v8, 16  ;;  %v2556_v35 = vor.u32 %v2919_v15, %v2555_v11  ;;  %v426_v36 = vrot.slane %v425_v24, 4  ;;  %v430_v37 = vrot.slane %v428_v17, 5  ;;  %v2559_v17 = vld [vmem:[%s3190_s26 + $0x78] sm:$0xf] }
  0x39   : > { %v605_v38 = vor.u32 %v604_v29, %v601_v28  ;;  %v665_v40 = vpack.c.b16 %v659_v26, %v658_v21  ;;  %v2576_v41 = vor.u32 %v2915_v23, %v2575_v22  ;;  %v622_v43 = vshll.u32 %v2601_v27, 16  ;;  %v2579_v21 = vld [vmem:[%s3190_s26 + $0x30] sm:$0xf]  ;;  %v2916_v24 = vld [vmem:[%s3190_s26 + $0x34] sm:$0xf0] }
  0x3a   : > { %v618_v42 = vrot.slane %v616_v34, 5  ;;  %v610_v45 = vrot.slane %v608_v30, 5  ;;  %v417_v46 = vsel %vm3212_vm4, %v412_v31, %v416_v32  ;;  %v433_v49 = vshrl.u32 %v341_v39, 16  ;;  %v2605_v31 = vld [vmem:[%s3190_s26 + $0x84] sm:$0x1] }
  0x3b   : > { %2587 = vmatmul.msk.bf16.gmra.mxu2 %vm219_vm1, %v471_v9  ;;  %v436_v50 = vshll.u32 %v341_v39, 16  ;;  %v431_v51 = vsel %vm3212_vm4, %v426_v36, %v430_v37  ;;  %v606_v52 = vrot.slane %v605_v38, 4  ;;  %v447_v53 = vshrl.u32 %v343_v44, 16  ;;  %v2603_v9 = vld [vmem:[%s3190_s26 + $0x7c] sm:$0x1] }
  0x3c   : > { %v619_v48 = vor.u32 %v618_v42, %v615_v33  ;;  %v450_v54 = vshll.u32 %v343_v44, 16  ;;  %v624_v57 = vrot.slane %v622_v43, 5  ;;  %v435_v58 = vrot.slane %v433_v49, 4  ;;  %v2669_v33 = vld [vmem:[%s3190_s26 + $0x90] sm:$0xf] }
  0x3d   : > { %v438_v59 = vrot.slane %v436_v50, 5  ;;  %v449_v61 = vrot.slane %v447_v53, 4  ;;  %v627_v0 = vshrl.u32 %v2602_v55, 16  ;;  %v630_v1 = vshll.u32 %v2602_v55, 16  ;;  %v2692_v50 = vld [vmem:[%s3190_s26 + $0xe0] sm:$0xf] }
  0x3e   : > { %2563 = vmatmul.msk.bf16.gmra.mxu0 %vm219_vm1, %v2556_v35  ;;  %2608 = vmatmul.msk.bf16.gmra.mxu3 %vm219_vm1, %v665_v40  ;;  %v620_v56 = vrot.slane %v619_v48, 4  ;;  %v452_v62 = vrot.slane %v450_v54, 5  ;;  %v466_v2 = vunpack.c.l.b16 %v417_v46  ;;  %v467_v3 = vunpack.c.l.b16 %v431_v51  ;;  %v2785_v51 = vld [vmem:[%s3788_s1 + $0x14] sm:$0x3] }
  0x3f   : > { %2583 = vmatmul.msk.bf16.gmra.mxu1 %vm219_vm1, %v2576_v41  ;;  %v611_v5 = vsel %vm3212_vm4, %v606_v52, %v610_v45  ;;  %v439_v7 = vor.u32 %v438_v59, %v435_v58  ;;  %v442_v8 = vshll.u32 %v342_v60, 16  ;;  %v629_v10 = vrot.slane %v627_v0, 4  ;;  %v2671_v41 = vld [vmem:[%s3190_s26 + $0x98] sm:$0xf] }
  0x40   : > { %v625_v6 = vsel %vm3212_vm4, %v620_v56, %v624_v57  ;;  %v632_v11 = vrot.slane %v630_v1, 5  ;;  %v641_v12 = vshrl.u32 %v2604_v63, 16  ;;  %v644_v13 = vshll.u32 %v2604_v63, 16  ;;  %v2690_v45 = vld [vmem:[%s3190_s26 + $0xd8] sm:$0xf] }
  0x41   : > { %v453_v14 = vor.u32 %v452_v62, %v449_v61  ;;  %v456_v15 = vshll.u32 %v344_v4, 16  ;;  %v472_v16 = vpack.c.b16 %v467_v3, %v466_v2  ;;  %v660_v18 = vunpack.c.l.b16 %v611_v5  ;;  %v2719_v56 = vld [vmem:[%s3788_s1 + $0x10] sm:$0x3]  ;;  %v2806_v57 = vld [vmem:[%s3788_s1 + $0x16] sm:$0x3] }
  0x42   : > { %v661_v19 = vunpack.c.l.b16 %v625_v6  ;;  %v444_v22 = vrot.slane %v442_v8, 5  ;;  %v636_v23 = vshll.u32 %v2603_v9, 16  ;;  %v440_v25 = vrot.slane %v439_v7, 4  ;;  %v2748_v62 = vld [vmem:[%s3788_s1 + $0x12] sm:$0x3] }
  0x43   : > { %v633_v26 = vor.u32 %v632_v11, %v629_v10  ;;  %v643_v27 = vrot.slane %v641_v12, 4  ;;  %v646_v28 = vrot.slane %v644_v13, 5  ;;  %v454_v29 = vrot.slane %v453_v14, 4  ;;  %v2670_v63 = vld [vmem:[%s3190_s26 + $0x94] sm:$0x1] }
  0x44   : > { %v458_v30 = vrot.slane %v456_v15, 5  ;;  %v2560_v32 = vor.u32 %v2920_v20, %v2559_v17  ;;  %v666_v34 = vpack.c.b16 %v661_v19, %v660_v18  ;;  %v2580_v35 = vor.u32 %v2916_v24, %v2579_v21  ;;  %v2622_v9 = vld [vmem:[%s3190_s26 + $0x90] sm:$0xf]  ;;  %v2672_v10 = vld [vmem:[%s3190_s26 + $0x9c] sm:$0x1] }
  0x45   : > { %v638_v36 = vrot.slane %v636_v23, 5  ;;  %v445_v37 = vsel %vm3212_vm4, %v440_v25, %v444_v22  ;;  %v634_v38 = vrot.slane %v633_v26, 4  ;;  %v647_v39 = vor.u32 %v646_v28, %v643_v27  ;;  %v2921_v13 = vld [vmem:[%s3190_s26 + $0x94] sm:$0xf0]  ;;  %v2691_v25 = vld [vmem:[%s3190_s26 + $0xdc] sm:$0x1] }
  0x46   : > { %v650_v40 = vshll.u32 %v2605_v31, 16  ;;  %v459_v42 = vsel %vm3212_vm4, %v454_v29, %v458_v30  ;;  %v903_v43 = vshrl.u32 %v2669_v33, 16  ;;  %v906_v44 = vshll.u32 %v2669_v33, 16  ;;  %v2651_v14 = vld [vmem:[%s3190_s26 + $0xd8] sm:$0xf] }
  0x47   : > { %v468_v46 = vunpack.c.l.b16 %v445_v37  ;;  %v917_v48 = vshrl.u32 %v2671_v41, 16  ;;  %v920_v49 = vshll.u32 %v2671_v41, 16  ;;  %v469_v52 = vunpack.c.l.b16 %v459_v42  ;;  %v2693_v26 = vld [vmem:[%s3190_s26 + $0xe4] sm:$0x1] }
  0x48   : > { %v639_v53 = vsel %vm3212_vm4, %v634_v38, %v638_v36  ;;  %v648_v54 = vrot.slane %v647_v39, 4  ;;  %v652_v55 = vrot.slane %v650_v40, 5  ;;  %v905_v58 = vrot.slane %v903_v43, 4  ;;  %v2673_v38 = vld [vmem:[%s3190_s26 + $0xa0] sm:$0xf] }
  0x49   : > { %v908_v59 = vrot.slane %v906_v44, 5  ;;  %v1097_v60 = vshrl.u32 %v2690_v45, 16  ;;  %v1595_v61 = vsel %vm232_vm0, %v2785_v51, 0  ;;  %v1100_v0 = vshll.u32 %v2690_v45, 16  ;;  %v2675_v39 = vld [vmem:[%s3190_s26 + $0xa8] sm:$0xf] }
  0x4a   : > { %v1111_v1 = vshrl.u32 %v2692_v50, 16  ;;  %v1114_v2 = vshll.u32 %v2692_v50, 16  ;;  %1604 = vmatpush.bf16.msra.mxu2 %v1595_v61  ;;  %v1318_v3 = vsel %vm232_vm0, %v2719_v56, 0  ;;  %v919_v4 = vrot.slane %v917_v48, 4  ;;  %v2694_v51 = vld [vmem:[%s3190_s26 + $0xe8] sm:$0xf] }
  0x4b   : > { %2588 = vmatmul.msk.bf16.gmra.mxu2 %vm219_vm1, %v472_v16  ;;  %v922_v5 = vrot.slane %v920_v49, 5  ;;  %1327 = vmatpush.bf16.msra.mxu0 %v1318_v3  ;;  %v1789_v6 = vsel %vm232_vm0, %v2806_v57, 0  ;;  %v1401_v7 = vsel %vm232_vm0, %v2748_v62, 0  ;;  %v653_v8 = vsel %vm3212_vm4, %v648_v54, %v652_v55  ;;  %v2925_v16 = vld [vmem:[%s3190_s26 + $0xdc] sm:$0xf0] }
  0x4c   : > { %1798 = vmatpush.bf16.msra.mxu3 %v1789_v6  ;;  %1410 = vmatpush.bf16.msra.mxu1 %v1401_v7  ;;  %v473_v11 = vpack.c.b16 %v469_v52, %v468_v46  ;;  %v662_v12 = vunpack.c.l.b16 %v639_v53  ;;  %v912_v15 = vshll.u32 %v2670_v63, 16  ;;  %v1099_v17 = vrot.slane %v1097_v60, 4  ;;  %v2696_v52 = vld [vmem:[%s3190_s26 + $0xf0] sm:$0xf]  ;;  %v2626_v6 = vld [vmem:[%s3190_s26 + $0xa0] sm:$0xf] }
  0x4d   : > { %v1102_v18 = vrot.slane %v1100_v0, 5  ;;  %v1113_v19 = vrot.slane %v1111_v1, 4  ;;  %v1116_v20 = vrot.slane %v1114_v2, 5  ;;  %v663_v21 = vunpack.c.l.b16 %v653_v8  ;;  %v2674_v1 = vld [vmem:[%s3190_s26 + $0xa4] sm:$0x1] }
  0x4e   : > { %2564 = vmatmul.msk.bf16.gmra.mxu0 %vm219_vm1, %v2560_v32  ;;  %2609 = vmatmul.msk.bf16.gmra.mxu3 %vm219_vm1, %v666_v34  ;;  %v909_v22 = vor.u32 %v908_v59, %v905_v58  ;;  %v923_v23 = vor.u32 %v922_v5, %v919_v4  ;;  %v926_v24 = vshll.u32 %v2672_v10, 16  ;;  %v2623_v27 = vor.u32 %v2921_v13, %v2622_v9  ;;  %v2676_v2 = vld [vmem:[%s3190_s26 + $0xac] sm:$0x1]  ;;  %v2922_v7 = vld [vmem:[%s3190_s26 + $0xa4] sm:$0xf0] }
  0x4f   : > { %2584 = vmatmul.msk.bf16.gmra.mxu1 %vm219_vm1, %v2580_v35  ;;  %v2652_v28 = vor.u32 %v2925_v16, %v2651_v14  ;;  %v914_v29 = vrot.slane %v912_v15, 5  ;;  %v1103_v30 = vor.u32 %v1102_v18, %v1099_v17  ;;  %v1106_v31 = vshll.u32 %v2691_v25, 16  ;;  %v2655_v8 = vld [vmem:[%s3190_s26 + $0xe8] sm:$0xf]  ;;  %v2926_v9 = vld [vmem:[%s3190_s26 + $0xec] sm:$0xf0] }
  0x50   : > { %v1117_v32 = vor.u32 %v1116_v20, %v1113_v19  ;;  %v1120_v33 = vshll.u32 %v2693_v26, 16  ;;  %v667_v34 = vpack.c.b16 %v663_v21, %v662_v12  ;;  %v910_v35 = vrot.slane %v909_v22, 4  ;;  %v2695_v18 = vld [vmem:[%s3190_s26 + $0xec] sm:$0x1]  ;;  %v2697_v19 = vld [vmem:[%s3190_s26 + $0xf4] sm:$0x1] }
  0x51   : > { %v924_v36 = vrot.slane %v923_v23, 4  ;;  %v928_v37 = vrot.slane %v926_v24, 5  ;;  %v1104_v40 = vrot.slane %v1103_v30, 4  ;;  %v1108_v41 = vrot.slane %v1106_v31, 5 }
  0x52   : > { %v1118_v42 = vrot.slane %v1117_v32, 4  ;;  %v1122_v43 = vrot.slane %v1120_v33, 5  ;;  %v915_v44 = vsel %vm3212_vm4, %v910_v35, %v914_v29  ;;  %v931_v46 = vshrl.u32 %v2673_v38, 16 }
  0x53   : > { %v929_v45 = vsel %vm3212_vm4, %v924_v36, %v928_v37  ;;  %v934_v48 = vshll.u32 %v2673_v38, 16  ;;  %v945_v49 = vshrl.u32 %v2675_v39, 16  ;;  %v948_v50 = vshll.u32 %v2675_v39, 16 }
  0x54   : > { %v1016_v53 = vunpack.c.l.b16 %v915_v44  ;;  %v1017_v54 = vunpack.c.l.b16 %v929_v45  ;;  %v1109_v55 = vsel %vm3212_vm4, %v1104_v40, %v1108_v41  ;;  %v1123_v56 = vsel %vm3212_vm4, %v1118_v42, %v1122_v43  ;;  %v2698_v43 = vld [vmem:[%s3190_s26 + $0xf8] sm:$0xf]  ;;  %v2700_v44 = vld [vmem:[%s3190_s26 + $0x100] sm:$0xf] }
  0x55   : > { %v1125_v57 = vshrl.u32 %v2694_v51, 16  ;;  %v1128_v58 = vshll.u32 %v2694_v51, 16  ;;  %v1139_v59 = vshrl.u32 %v2696_v52, 16  ;;  %v1142_v60 = vshll.u32 %v2696_v52, 16 }
  0x56   : > { %v933_v61 = vrot.slane %v931_v46, 4  ;;  %v936_v62 = vrot.slane %v934_v48, 5  ;;  %v947_v63 = vrot.slane %v945_v49, 4  ;;  %v950_v0 = vrot.slane %v948_v50, 5 }
  0x57   : > { %v1024_v3 = vpack.c.b16 %v1017_v54, %v1016_v53  ;;  %v1210_v4 = vunpack.c.l.b16 %v1109_v55  ;;  %v1211_v5 = vunpack.c.l.b16 %v1123_v56  ;;  %v1127_v10 = vrot.slane %v1125_v57, 4  ;;  %v2678_v54 = vld [vmem:[%s3190_s26 + $0xb4] sm:$0x1]  ;;  %v2680_v55 = vld [vmem:[%s3190_s26 + $0xbc] sm:$0x1] }
  0x58   : > { %v1141_v12 = vrot.slane %v1139_v59, 4  ;;  %v1144_v13 = vrot.slane %v1142_v60, 5  ;;  %v937_v14 = vor.u32 %v936_v62, %v933_v61  ;;  %v940_v15 = vshll.u32 %v2674_v1, 16  ;;  %v2630_v60 = vld [vmem:[%s3190_s26 + $0xb0] sm:$0xf] }
  0x59   : > { %v951_v16 = vor.u32 %v950_v0, %v947_v63  ;;  %v954_v17 = vshll.u32 %v2676_v2, 16  ;;  %v1218_v20 = vpack.c.b16 %v1211_v5, %v1210_v4  ;;  %v2627_v21 = vor.u32 %v2922_v7, %v2626_v6  ;;  %v2923_v61 = vld [vmem:[%s3190_s26 + $0xb4] sm:$0xf0]  ;;  %v2927_v6 = vld [vmem:[%s3190_s26 + $0xfc] sm:$0xf0] }
  0x5a   : > { %v2656_v22 = vor.u32 %v2926_v9, %v2655_v8  ;;  %v1134_v24 = vshll.u32 %v2695_v18, 16  ;;  %v1145_v25 = vor.u32 %v1144_v13, %v1141_v12  ;;  %v1148_v26 = vshll.u32 %v2697_v19, 16  ;;  %v2659_v5 = vld [vmem:[%s3190_s26 + $0xf8] sm:$0xf]  ;;  %v2699_v12 = vld [vmem:[%s3190_s26 + $0xfc] sm:$0x1] }
  0x5b   : > { %2589 = vmatmul.msk.bf16.gmra.mxu2 %vm219_vm1, %v473_v11  ;;  %v1130_v11 = vrot.slane %v1128_v58, 5  ;;  %v938_v29 = vrot.slane %v937_v14, 4  ;;  %v942_v30 = vrot.slane %v940_v15, 5  ;;  %v952_v31 = vrot.slane %v951_v16, 4  ;;  %v2701_v13 = vld [vmem:[%s3190_s26 + $0x104] sm:$0x1] }
  0x5c   : > { %v956_v32 = vrot.slane %v954_v17, 5  ;;  %v1136_v38 = vrot.slane %v1134_v24, 5  ;;  %v1146_v39 = vrot.slane %v1145_v25, 4  ;;  %v1150_v40 = vrot.slane %v1148_v26, 5  ;;  %v2681_v24 = vld [vmem:[%s3190_s26 + $0xc0] sm:$0xf] }
  0x5d   : > { %v1131_v23 = vor.u32 %v1130_v11, %v1127_v10  ;;  %v943_v41 = vsel %vm3212_vm4, %v938_v29, %v942_v30  ;;  %v1153_v56 = vshrl.u32 %v2698_v43, 16  ;;  %v1156_v57 = vshll.u32 %v2698_v43, 16  ;;  %v2683_v25 = vld [vmem:[%s3190_s26 + $0xc8] sm:$0xf]  ;;  %v2684_v43 = vld [vmem:[%s3190_s26 + $0xcc] sm:$0x1] }
  0x5e   : > { %2636 = vmatmul.msk.bf16.vlgmr.msrb.gmra.mxu0 %vm219_vm1, %v2623_v27  ;;  %2610 = vmatmul.msk.bf16.gmra.mxu3 %vm219_vm1, %v667_v34  ;;  %v2677_v27 = vld [vmem:[%s3190_s26 + $0xb0] sm:$0xf]  ;;  %v957_v42 = vsel %vm3212_vm4, %v952_v31, %v956_v32  ;;  %v1018_v50 = vunpack.c.l.b16 %v943_v41  ;;  %v1151_v53 = vsel %vm3212_vm4, %v1146_v39, %v1150_v40  ;;  %v1167_v58 = vshrl.u32 %v2700_v44, 16 }
  0x5f   : > { %2665 = vmatmul.msk.bf16.vlgmr.msrb.gmra.mxu1 %vm219_vm1, %v2652_v28  ;;  %v2679_v28 = vld [vmem:[%s3190_s26 + $0xb8] sm:$0xf]  ;;  %v959_v33 = vshrl.u32 %v2677_v27, 16  ;;  %v962_v34 = vshll.u32 %v2677_v27, 16  ;;  %v1132_v37 = vrot.slane %v1131_v23, 4  ;;  %v1019_v51 = vunpack.c.l.b16 %v957_v42 }
  0x60   : > { %v973_v35 = vshrl.u32 %v2679_v28, 16  ;;  %v976_v36 = vshll.u32 %v2679_v28, 16  ;;  %v1170_v59 = vshll.u32 %v2700_v44, 16  ;;  %v968_v63 = vshll.u32 %v2678_v54, 16  ;;  %v2702_v28 = vld [vmem:[%s3190_s26 + $0x108] sm:$0xf] }
  0x61   : > { %v961_v45 = vrot.slane %v959_v33, 4  ;;  %v964_v46 = vrot.slane %v962_v34, 5  ;;  %v1137_v52 = vsel %vm3212_vm4, %v1132_v37, %v1136_v38  ;;  %v982_v1 = vshll.u32 %v2680_v55, 16  ;;  %v2704_v33 = vld [vmem:[%s3190_s26 + $0x110] sm:$0xf] }
  0x62   : > { %v975_v48 = vrot.slane %v973_v35, 4  ;;  %v978_v49 = vrot.slane %v976_v36, 5  ;;  %v1025_v2 = vpack.c.b16 %v1019_v51, %v1018_v50  ;;  %v1213_v4 = vunpack.c.l.b16 %v1151_v53  ;;  %v2682_v42 = vld [vmem:[%s3190_s26 + $0xc4] sm:$0x1] }
  0x63   : > { %v965_v62 = vor.u32 %v964_v46, %v961_v45  ;;  %v1155_v7 = vrot.slane %v1153_v56, 4  ;;  %v1158_v8 = vrot.slane %v1156_v57, 5  ;;  %v1169_v9 = vrot.slane %v1167_v58, 4  ;;  %v2703_v58 = vld [vmem:[%s3190_s26 + $0x10c] sm:$0x1] }
  0x64   : > { %v979_v0 = vor.u32 %v978_v49, %v975_v48  ;;  %v1172_v10 = vrot.slane %v1170_v59, 5  ;;  %v2631_v11 = vor.u32 %v2923_v61, %v2630_v60  ;;  %v970_v15 = vrot.slane %v968_v63, 5  ;;  %v2705_v59 = vld [vmem:[%s3190_s26 + $0x114] sm:$0x1] }
  0x65   : > { %v966_v14 = vrot.slane %v965_v62, 4  ;;  %v984_v17 = vrot.slane %v982_v1, 5  ;;  %v2660_v19 = vor.u32 %v2927_v6, %v2659_v5  ;;  %v1176_v23 = vshll.u32 %v2701_v13, 16  ;;  %v2924_v1 = vld [vmem:[%s3190_s26 + $0xc4] sm:$0xf0] }
  0x66   : > { %v980_v16 = vrot.slane %v979_v0, 4  ;;  %v987_v29 = vshrl.u32 %v2681_v24, 16  ;;  %v990_v30 = vshll.u32 %v2681_v24, 16  ;;  %v1001_v31 = vshrl.u32 %v2683_v25, 16  ;;  %v2634_v0 = vld [vmem:[%s3190_s26 + $0xc0] sm:$0xf] }
  0x67   : > { %v971_v26 = vsel %vm3212_vm4, %v966_v14, %v970_v15  ;;  %v1004_v32 = vshll.u32 %v2683_v25, 16  ;;  %v1178_v37 = vrot.slane %v1176_v23, 5  ;;  %v1181_v38 = vshrl.u32 %v2702_v28, 16  ;;  %v2928_v5 = vld [vmem:[%s3190_s26 + $0x10c] sm:$0xf0] }
  0x68   : > { %v985_v27 = vsel %vm3212_vm4, %v980_v16, %v984_v17  ;;  %v1184_v39 = vshll.u32 %v2702_v28, 16  ;;  %v1020_v40 = vunpack.c.l.b16 %v971_v26  ;;  %v1195_v44 = vshrl.u32 %v2704_v33, 16  ;;  %v2769_v17 = vld [vmem:[%s3190_s26 + $0x8] sm:$0xf] }
  0x69   : > { %v1021_v41 = vunpack.c.l.b16 %v985_v27  ;;  %v1198_v45 = vshll.u32 %v2704_v33, 16  ;;  %v989_v46 = vrot.slane %v987_v29, 4  ;;  %v992_v48 = vrot.slane %v990_v30, 5  ;;  %v2792_v27 = vld [vmem:[%s3190_s26 + $0x58] sm:$0xf] }
  0x6a   : > { %v1003_v49 = vrot.slane %v1001_v31, 4  ;;  %v1006_v50 = vrot.slane %v1004_v32, 5  ;;  %v996_v53 = vshll.u32 %v2682_v42, 16  ;;  %v1010_v54 = vshll.u32 %v2684_v43, 16  ;;  %v2885_v30 = vld [vmem:[%s3788_s1 + $0x1c] sm:$0x3] }
  0x6b   : > { %2686 = vmatmul.msk.bf16.vlgmr.msrb.gmra.mxu2 %vm219_vm1, %v1024_v3  ;;  %v1212_v3 = vunpack.c.l.b16 %v1137_v52  ;;  %v1183_v55 = vrot.slane %v1181_v38, 4  ;;  %v1186_v56 = vrot.slane %v1184_v39, 5  ;;  %v1026_v57 = vpack.c.b16 %v1021_v41, %v1020_v40  ;;  %v2819_v31 = vld [vmem:[%s3788_s1 + $0x18] sm:$0x3]  ;;  %v2906_v32 = vld [vmem:[%s3788_s1 + $0x1e] sm:$0x3] }
  0x6c   : > { %v1197_v60 = vrot.slane %v1195_v44, 4  ;;  %v1200_v61 = vrot.slane %v1198_v45, 5  ;;  %v1457_v24 = vshrl.u32 %v2769_v17, 16  ;;  %v1460_v25 = vshll.u32 %v2769_v17, 16 }
  0x6d   : > { %v1219_v18 = vpack.c.b16 %v1213_v4, %v1212_v3  ;;  %v1007_v3 = vor.u32 %v1006_v50, %v1003_v49  ;;  %v2663_v4 = vld [vmem:[%s3190_s26 + $0x108] sm:$0xf]  ;;  %v1187_v6 = vor.u32 %v1186_v56, %v1183_v55  ;;  %v1665_v40 = vshrl.u32 %v2792_v27, 16  ;;  %v2791_v56 = vld [vmem:[%s3190_s26 + $0x54] sm:$0x1] }
  0x6e   : > { %2637 = vmatmul.msk.bf16.gmra.mxu0 %vm219_vm1, %v2627_v21  ;;  %2707 = vmatmul.msk.bf16.vlgmr.msrb.gmra.mxu3 %vm219_vm1, %v1218_v20  ;;  %v1159_v20 = vor.u32 %v1158_v8, %v1155_v7  ;;  %v1162_v21 = vshll.u32 %v2699_v12, 16  ;;  %v1190_v7 = vshll.u32 %v2703_v58, 16  ;;  %v1204_v8 = vshll.u32 %v2705_v59, 16 }
  0x6f   : > { %2666 = vmatmul.msk.bf16.gmra.mxu1 %vm219_vm1, %v2656_v22  ;;  %v1173_v22 = vor.u32 %v1172_v10, %v1169_v9  ;;  %v2635_v9 = vor.u32 %v2924_v1, %v2634_v0  ;;  %v998_v10 = vrot.slane %v996_v53, 5  ;;  %v1201_v12 = vor.u32 %v1200_v61, %v1197_v60  ;;  %v2772_v53 = vld [vmem:[%s3190_s26 + $0x14] sm:$0x1]  ;;  %v2793_v0 = vld [vmem:[%s3190_s26 + $0x5c] sm:$0x1] }
  0x70   : > { %v1160_v34 = vrot.slane %v1159_v20, 4  ;;  %v1164_v35 = vrot.slane %v1162_v21, 5  ;;  %v2664_v14 = vor.u32 %v2928_v5, %v2663_v4  ;;  %v1008_v16 = vrot.slane %v1007_v3, 4  ;;  %v2751_v1 = vld [vmem:[%s3190_s26 + $0x50] sm:$0xf] }
  0x71   : > { %v1174_v36 = vrot.slane %v1173_v22, 4  ;;  %v1192_v20 = vrot.slane %v1190_v7, 5  ;;  %v1206_v21 = vrot.slane %v1204_v8, 5  ;;  %v2790_v22 = vld [vmem:[%s3190_s26 + $0x50] sm:$0xf]  ;;  %v1202_v23 = vrot.slane %v1201_v12, 4 }
  0x72   : > { %v1165_v51 = vsel %vm3212_vm4, %v1160_v34, %v1164_v35  ;;  %v2149_v34 = vsel %vm232_vm0, %v2885_v30, 0  ;;  %v1872_v35 = vsel %vm232_vm0, %v2819_v31, 0  ;;  %v1654_v38 = vshll.u32 %v2790_v22, 16 }
  0x73   : > { %v1179_v52 = vsel %vm3212_vm4, %v1174_v36, %v1178_v37  ;;  %v1214_v62 = vunpack.c.l.b16 %v1165_v51  ;;  %v2343_v36 = vsel %vm232_vm0, %v2906_v32, 0  ;;  %v1651_v37 = vshrl.u32 %v2790_v22, 16  ;;  %2158 = vmatpush.bf16.msrb.mxu2 %v2149_v34  ;;  %1881 = vmatpush.bf16.msrb.mxu0 %v1872_v35  ;;  %v2796_v34 = vld [vmem:[%s3190_s26 + $0x68] sm:$0xf] }
  0x74   : > { %v1215_v63 = vunpack.c.l.b16 %v1179_v52  ;;  %v1668_v41 = vshll.u32 %v2792_v27, 16  ;;  %2352 = vmatpush.bf16.msrb.mxu3 %v2343_v36  ;;  %v1207_v44 = vsel %vm3212_vm4, %v1202_v23, %v1206_v21  ;;  %v1459_v45 = vrot.slane %v1457_v24, 4  ;;  %v2770_v52 = vld [vmem:[%s3190_s26 + $0xc] sm:$0x1]  ;;  %v2775_v21 = vld [vmem:[%s3190_s26 + $0x20] sm:$0xf] }
  0x75   : > { %v1656_v55 = vrot.slane %v1654_v38, 5  ;;  %v1217_v61 = vunpack.c.l.b16 %v1207_v44  ;;  %v1466_v4 = vshll.u32 %v2770_v52, 16  ;;  %v1660_v8 = vshll.u32 %v2791_v56, 16  ;;  %v2930_v56 = vld [vmem:[%s3190_s26 + $0x1c] sm:$0xf0] }
  0x76   : > { %v1220_v13 = vpack.c.b16 %v1215_v63, %v1214_v62  ;;  %v1670_v58 = vrot.slane %v1668_v41, 5  ;;  %v2722_v62 = vld [vmem:[%s3190_s26 + $0x8] sm:$0xf]  ;;  %v2929_v63 = vld [vmem:[%s3190_s26 + $0xc] sm:$0xf0]  ;;  %v1502_v30 = vshll.u32 %v2775_v21, 16 }
  0x77   : > { %v1662_v24 = vrot.slane %v1660_v8, 5 }
  0x78   : > { %v1504_v44 = vrot.slane %v1502_v30, 5 }
  0x7b   : > { %2687 = vmatmul.msk.bf16.gmra.mxu2 %vm219_vm1, %v1025_v2  ;;  %v993_v2 = vor.u32 %v992_v48, %v989_v46  ;;  %v2848_v46 = vld [vmem:[%s3788_s1 + $0x1a] sm:$0x3]  ;;  %v1462_v48 = vrot.slane %v1460_v25, 5 }
  0x7c   : > { %v1955_v51 = vsel %vm232_vm0, %v2848_v46, 0  ;;  %v2776_v46 = vld [vmem:[%s3190_s26 + $0x24] sm:$0x1] }
  0x7d   : > { %v994_v15 = vrot.slane %v993_v2, 4  ;;  %1964 = vmatpush.bf16.msrb.mxu1 %v1955_v51  ;;  %v2933_v2 = vld [vmem:[%s3190_s26 + $0x54] sm:$0xf0]  ;;  %v1463_v3 = vor.u32 %v1462_v48, %v1459_v45  ;;  %v1696_v51 = vshll.u32 %v2796_v34, 16 }
  0x7e   : > { %2638 = vmatmul.msk.bf16.gmra.mxu0 %vm219_vm1, %v2631_v11  ;;  %2708 = vmatmul.msk.bf16.gmra.mxu3 %vm219_vm1, %v1219_v18  ;;  %v1012_v11 = vrot.slane %v1010_v54, 5  ;;  %v2771_v18 = vld [vmem:[%s3190_s26 + $0x10] sm:$0xf]  ;;  %v1653_v54 = vrot.slane %v1651_v37, 4 }
  0x7f   : > { %2667 = vmatmul.msk.bf16.gmra.mxu1 %vm219_vm1, %v2660_v19  ;;  %v1188_v19 = vrot.slane %v1187_v6, 4  ;;  %v1471_v26 = vshrl.u32 %v2771_v18, 16  ;;  %v999_v28 = vsel %vm3212_vm4, %v994_v15, %v998_v10  ;;  %v1474_v33 = vshll.u32 %v2771_v18, 16  ;;  %v2773_v15 = vld [vmem:[%s3190_s26 + $0x18] sm:$0xf] }
  0x80   : > { %v1013_v29 = vsel %vm3212_vm4, %v1008_v16, %v1012_v11  ;;  %v1022_v39 = vunpack.c.l.b16 %v999_v28  ;;  %v1480_v6 = vshll.u32 %v2772_v53, 16  ;;  %v1657_v7 = vor.u32 %v1656_v55, %v1653_v54  ;;  %v2726_v55 = vld [vmem:[%s3190_s26 + $0x18] sm:$0xf] }
  0x81   : > { %v1023_v42 = vunpack.c.l.b16 %v1013_v29  ;;  %v1193_v43 = vsel %vm3212_vm4, %v1188_v19, %v1192_v20  ;;  %v1473_v49 = vrot.slane %v1471_v26, 4  ;;  %v1476_v50 = vrot.slane %v1474_v33, 5  ;;  %v2794_v33 = vld [vmem:[%s3190_s26 + $0x60] sm:$0xf] }
  0x82   : > { %v1216_v60 = vunpack.c.l.b16 %v1193_v43  ;;  %v1674_v11 = vshll.u32 %v2793_v0, 16  ;;  %v1464_v17 = vrot.slane %v1463_v3, 4  ;;  %v1468_v18 = vrot.slane %v1466_v4, 5  ;;  %v2795_v0 = vld [vmem:[%s3190_s26 + $0x64] sm:$0x1] }
  0x83   : > { %v1027_v59 = vpack.c.b16 %v1023_v42, %v1022_v39  ;;  %v1477_v5 = vor.u32 %v1476_v50, %v1473_v49  ;;  %v1482_v20 = vrot.slane %v1480_v6, 5  ;;  %v1658_v23 = vrot.slane %v1657_v7, 4  ;;  %v2774_v42 = vld [vmem:[%s3190_s26 + $0x1c] sm:$0x1] }
  0x84   : > { %v1221_v12 = vpack.c.b16 %v1217_v61, %v1216_v60  ;;  %v1676_v26 = vrot.slane %v1674_v11, 5  ;;  %v1485_v27 = vshrl.u32 %v2773_v15, 16  ;;  %v1488_v28 = vshll.u32 %v2773_v15, 16  ;;  %v2934_v61 = vld [vmem:[%s3190_s26 + $0x64] sm:$0xf0] }
  0x85   : > { %v1478_v19 = vrot.slane %v1477_v5, 4  ;;  %v1499_v29 = vshrl.u32 %v2775_v21, 16  ;;  %v1469_v31 = vsel %vm3212_vm4, %v1464_v17, %v1468_v18  ;;  %v1663_v35 = vsel %vm3212_vm4, %v1658_v23, %v1662_v24  ;;  %v2777_v11 = vld [vmem:[%s3190_s26 + $0x28] sm:$0xf]  ;;  %v2779_v21 = vld [vmem:[%s3190_s26 + $0x30] sm:$0xf] }
  0x86   : > { %v1487_v37 = vrot.slane %v1485_v27, 4  ;;  %v1490_v38 = vrot.slane %v1488_v28, 5  ;;  %v1679_v48 = vshrl.u32 %v2794_v33, 16  ;;  %v1682_v49 = vshll.u32 %v2794_v33, 16 }
  0x87   : > { %v1483_v32 = vsel %vm3212_vm4, %v1478_v19, %v1482_v20  ;;  %v1501_v43 = vrot.slane %v1499_v29, 4  ;;  %v1693_v50 = vshrl.u32 %v2796_v34, 16  ;;  %v1764_v53 = vunpack.c.l.b16 %v1663_v35 }
  0x88   : > { %v1571_v41 = vunpack.c.l.b16 %v1483_v32  ;;  %v1684_v3 = vrot.slane %v1682_v49, 5  ;;  %v1698_v5 = vrot.slane %v1696_v51, 5  ;;  %v2727_v7 = vor.u32 %v2930_v56, %v2726_v55  ;;  %v2800_v32 = vld [vmem:[%s3190_s26 + $0x78] sm:$0xf]  ;;  %v2780_v56 = vld [vmem:[%s3190_s26 + $0x34] sm:$0x1] }
  0x89   : > { %v1695_v4 = vrot.slane %v1693_v50, 4  ;;  %v1688_v15 = vshll.u32 %v2795_v0, 16  ;;  %v1513_v23 = vshrl.u32 %v2777_v11, 16  ;;  %v1516_v24 = vshll.u32 %v2777_v11, 16 }
  0x8a   : > { %v1527_v35 = vshrl.u32 %v2779_v21, 16  ;;  %v1536_v11 = vshll.u32 %v2780_v56, 16  ;;  %v2782_v56 = vld [vmem:[%s3190_s26 + $0x3c] sm:$0x1] }
  0x8b   : > { %2688 = vmatmul.msk.bf16.gmra.mxu2 %vm219_vm1, %v1026_v57  ;;  %v1667_v57 = vrot.slane %v1665_v40, 4  ;;  %v1570_v40 = vunpack.c.l.b16 %v1469_v31  ;;  %v1699_v19 = vor.u32 %v1698_v5, %v1695_v4  ;;  %v1690_v29 = vrot.slane %v1688_v15, 5  ;;  %v2798_v31 = vld [vmem:[%s3190_s26 + $0x70] sm:$0xf] }
  0x8d   : > { %v1671_v10 = vor.u32 %v1670_v58, %v1667_v57  ;;  %v2755_v57 = vld [vmem:[%s3190_s26 + $0x60] sm:$0xf]  ;;  %v1491_v58 = vor.u32 %v1490_v38, %v1487_v37  ;;  %v1578_v60 = vpack.c.b16 %v1571_v41, %v1570_v40  ;;  %v1700_v34 = vrot.slane %v1699_v19, 4  ;;  %v2778_v40 = vld [vmem:[%s3190_s26 + $0x2c] sm:$0x1] }
  0x8e   : > { %2639 = vmatmul.msk.bf16.gmra.mxu0 %vm219_vm1, %v2635_v9  ;;  %2709 = vmatmul.msk.bf16.gmra.mxu3 %vm219_vm1, %v1220_v13  ;;  %v2723_v9 = vor.u32 %v2929_v63, %v2722_v62  ;;  %v1505_v62 = vor.u32 %v1504_v44, %v1501_v43  ;;  %v1508_v63 = vshll.u32 %v2776_v46, 16  ;;  %v2756_v8 = vor.u32 %v2934_v61, %v2755_v57  ;;  %v2801_v61 = vld [vmem:[%s3190_s26 + $0x7c] sm:$0x1] }
  0x8f   : > { %2668 = vmatmul.msk.bf16.gmra.mxu1 %vm219_vm1, %v2664_v14  ;;  %v2752_v14 = vor.u32 %v2933_v2, %v2751_v1  ;;  %v1672_v25 = vrot.slane %v1671_v10, 4  ;;  %v2797_v1 = vld [vmem:[%s3190_s26 + $0x6c] sm:$0x1]  ;;  %v1681_v2 = vrot.slane %v1679_v48, 4  ;;  %v1515_v37 = vrot.slane %v1513_v23, 4 }
  0x90   : > { %v1518_v38 = vrot.slane %v1516_v24, 5  ;;  %v1707_v41 = vshrl.u32 %v2798_v31, 16  ;;  %v1724_v43 = vshll.u32 %v2800_v32, 16  ;;  %v1730_v15 = vshll.u32 %v2801_v61, 16 }
  0x91   : > { %v1677_v36 = vsel %vm3212_vm4, %v1672_v25, %v1676_v26  ;;  %v1685_v18 = vor.u32 %v1684_v3, %v1681_v2 }
  0x92   : > { %v1765_v54 = vunpack.c.l.b16 %v1677_v36  ;;  %v1530_v36 = vshll.u32 %v2779_v21, 16  ;;  %v1519_v57 = vor.u32 %v1518_v38, %v1515_v37 }
  0x93   : > { %v1686_v33 = vrot.slane %v1685_v18, 4 }
  0x94   : > { %v1772_v6 = vpack.c.b16 %v1765_v54, %v1764_v53  ;;  %v1529_v53 = vrot.slane %v1527_v35, 4  ;;  %v1532_v54 = vrot.slane %v1530_v36, 5 }
  0x95   : > { %v1691_v50 = vsel %vm3212_vm4, %v1686_v33, %v1690_v29  ;;  %v2783_v29 = vld [vmem:[%s3190_s26 + $0x40] sm:$0xf]  ;;  %v1732_v33 = vrot.slane %v1730_v15, 5  ;;  %v2803_v15 = vld [vmem:[%s3190_s26 + $0x84] sm:$0x1] }
  0x96   : > { %v1766_v4 = vunpack.c.l.b16 %v1691_v50 }
  0x9b   : > { %2689 = vmatmul.msk.bf16.gmra.mxu2 %vm219_vm1, %v1027_v59  ;;  %v245_v13 = vpop.f32.mrf.mxu0  ;;  %v309_v16 = vpop.f32.mrf.mxu1  ;;  %v1494_v59 = vshll.u32 %v2774_v42, 16  ;;  %v1721_v42 = vshrl.u32 %v2800_v32, 16 }
  0x9c   : > { %v3439_v22 = vadd.f32 %v309_v16, %v245_v13  ;;  %v1506_v13 = vrot.slane %v1505_v62, 4  ;;  %v1702_v16 = vshll.u32 %v2797_v1, 16  ;;  %v1709_v62 = vrot.slane %v1707_v41, 4 }
  0x9d   : > { %v1496_v10 = vrot.slane %v1494_v59, 5  ;;  %v2799_v59 = vld [vmem:[%s3190_s26 + $0x74] sm:$0x1]  ;;  %v1723_v0 = vrot.slane %v1721_v42, 4  ;;  %v1726_v1 = vrot.slane %v1724_v43, 5  ;;  %v1558_v41 = vshll.u32 %v2783_v29, 16 }
  0x9e   : > { %2736 = vmatmul.msk.bf16.vlgmr.msra.gmra.mxu0 %vm219_vm1, %v2723_v9  ;;  %2710 = vmatmul.msk.bf16.gmra.mxu3 %vm219_vm1, %v1221_v12  ;;  %v1492_v9 = vrot.slane %v1491_v58, 4  ;;  %v1704_v30 = vrot.slane %v1702_v16, 5  ;;  %v1522_v58 = vshll.u32 %v2778_v40, 16  ;;  %v1555_v40 = vshrl.u32 %v2783_v29, 16  ;;  %v2802_v43 = vld [vmem:[%s3190_s26 + $0x80] sm:$0xf] }
  0x9f   : > { %2765 = vmatmul.msk.bf16.vlgmr.msra.gmra.mxu1 %vm219_vm1, %v2752_v14  ;;  %v1510_v14 = vrot.slane %v1508_v63, 5  ;;  %v1727_v19 = vor.u32 %v1726_v1, %v1723_v0  ;;  %v1735_v61 = vshrl.u32 %v2802_v43, 16 }
  0xa0   : > { %v1497_v26 = vsel %vm3212_vm4, %v1492_v9, %v1496_v10  ;;  %v1705_v51 = vsel %vm3212_vm4, %v1700_v34, %v1704_v30  ;;  %v2935_v9 = vld [vmem:[%s3190_s26 + $0x74] sm:$0xf0]  ;;  %v1533_v10 = vor.u32 %v1532_v54, %v1529_v53 }
  0xa1   : > { %v1511_v28 = vsel %vm3212_vm4, %v1506_v13, %v1510_v14  ;;  %v1572_v46 = vunpack.c.l.b16 %v1497_v26  ;;  %v1767_v5 = vunpack.c.l.b16 %v1705_v51  ;;  %v1524_v13 = vrot.slane %v1522_v58, 5 }
  0xa2   : > { %v1573_v48 = vunpack.c.l.b16 %v1511_v28  ;;  %v1716_v14 = vshll.u32 %v2799_v59, 16  ;;  %v1538_v28 = vrot.slane %v1536_v11, 5  ;;  %v1728_v36 = vrot.slane %v1727_v19, 4 }
  0xa3   : > { %v247_v39 = vpop.f32.mrf.mxu0  ;;  %v311_v45 = vpop.f32.mrf.mxu1  ;;  %v1773_v21 = vpack.c.b16 %v1767_v5, %v1766_v4  ;;  %v1557_v58 = vrot.slane %v1555_v40, 4  ;;  %v1560_v59 = vrot.slane %v1558_v41, 5  ;;  %v2734_v5 = vld [vmem:[%s3190_s26 + $0x38] sm:$0xf] }
  0xa4   : > { %v3456_v52 = vadd.f32 %v311_v45, %v247_v39  ;;  %v1579_v3 = vpack.c.b16 %v1573_v48, %v1572_v46  ;;  %v1718_v32 = vrot.slane %v1716_v14, 5 }
  0xa5   : > { %v1561_v14 = vor.u32 %v1560_v59, %v1557_v58 }
  0xab   : > { %2786 = vmatmul.msk.bf16.vlgmr.msra.gmra.mxu2 %vm219_vm1, %v1578_v60  ;;  %v250_v12 = vpop.f32.mrf.mxu0 }
  0xac   : > { %v314_v17 = vpop.f32.mrf.mxu1 }
  0xad   : > { %v3466_v20 = vadd.f32 %v314_v17, %v250_v12  ;;  %v1520_v12 = vrot.slane %v1519_v57, 4  ;;  %v2784_v57 = vld [vmem:[%s3190_s26 + $0x44] sm:$0x1] }
  0xae   : > { %v498_v25 = vpop.f32.mrf.mxu2  ;;  %2737 = vmatmul.msk.bf16.gmra.mxu0 %vm219_vm1, %v2727_v7  ;;  %2807 = vmatmul.msk.bf16.vlgmr.msra.gmra.mxu3 %vm219_vm1, %v1772_v6  ;;  %v2730_v6 = vld [vmem:[%s3190_s26 + $0x28] sm:$0xf]  ;;  %v2931_v7 = vld [vmem:[%s3190_s26 + $0x2c] sm:$0xf0] }
  0xaf   : > { %v518_v27 = vadd.f32 %v498_v25, %v3439_v22  ;;  %2766 = vmatmul.msk.bf16.gmra.mxu1 %vm219_vm1, %v2756_v8  ;;  %v1710_v22 = vshll.u32 %v2798_v31, 16  ;;  %v2759_v8 = vld [vmem:[%s3190_s26 + $0x70] sm:$0xf]  ;;  %v2731_v17 = vor.u32 %v2931_v7, %v2730_v6  ;;  %v2781_v25 = vld [vmem:[%s3190_s26 + $0x38] sm:$0xf]  ;;  %v1525_v31 = vsel %vm3212_vm4, %v1520_v12, %v1524_v13 }
  0xb0   : > { %v2760_v24 = vor.u32 %v2935_v9, %v2759_v8  ;;  %v1541_v37 = vshrl.u32 %v2781_v25, 16  ;;  %v1544_v38 = vshll.u32 %v2781_v25, 16  ;;  %v1574_v42 = vunpack.c.l.b16 %v1525_v31  ;;  %v2932_v6 = vld [vmem:[%s3190_s26 + $0x3c] sm:$0xf0]  ;;  %v2936_v13 = vld [vmem:[%s3190_s26 + $0x84] sm:$0xf0] }
  0xb1   : > { %v692_v39 = vpop.f32.mrf.mxu3  ;;  %v1712_v63 = vrot.slane %v1710_v22, 5  ;;  %v1550_v8 = vshll.u32 %v2782_v56, 16  ;;  %v1564_v9 = vshll.u32 %v2784_v57, 16  ;;  %v2763_v12 = vld [vmem:[%s3190_s26 + $0x80] sm:$0xf] }
  0xb2   : > { %v3480_v44 = vadd.f32 %v692_v39, %v518_v27  ;;  %v1534_v27 = vrot.slane %v1533_v10, 4  ;;  %v1546_v50 = vrot.slane %v1544_v38, 5  ;;  %v2869_v25 = vld [vmem:[%s3190_s26 + $0x98] sm:$0xf] }
  0xb3   : > { %v252_v45 = vpop.f32.mrf.mxu0  ;;  %v1713_v18 = vor.u32 %v1712_v63, %v1709_v62  ;;  %v1738_v62 = vshll.u32 %v2802_v43, 16  ;;  %v1552_v29 = vrot.slane %v1550_v8, 5  ;;  %v1566_v31 = vrot.slane %v1564_v9, 5 }
  0xb4   : > { %v316_v49 = vpop.f32.mrf.mxu1  ;;  %v1539_v22 = vsel %vm3212_vm4, %v1534_v27, %v1538_v28  ;;  %v2764_v27 = vor.u32 %v2936_v13, %v2763_v12  ;;  %v2011_v40 = vshrl.u32 %v2869_v25, 16  ;;  %v2014_v41 = vshll.u32 %v2869_v25, 16 }
  0xb5   : > { %v3486_v55 = vadd.f32 %v316_v49, %v252_v45  ;;  %v1714_v35 = vrot.slane %v1713_v18, 4  ;;  %v2804_v45 = vld [vmem:[%s3190_s26 + $0x88] sm:$0xf]  ;;  %v1733_v49 = vsel %vm3212_vm4, %v1728_v36, %v1732_v33  ;;  %v1575_v54 = vunpack.c.l.b16 %v1539_v22 }
  0xb6   : > { %v500_v60 = vpop.f32.mrf.mxu2  ;;  %v1749_v63 = vshrl.u32 %v2804_v45, 16  ;;  %v1752_v0 = vshll.u32 %v2804_v45, 16  ;;  %v1740_v18 = vrot.slane %v1738_v62, 5  ;;  %v2013_v58 = vrot.slane %v2011_v40, 4 }
  0xb7   : > { %v519_v2 = vadd.f32 %v500_v60, %v3456_v52  ;;  %v1719_v48 = vsel %vm3212_vm4, %v1714_v35, %v1718_v32  ;;  %v1580_v11 = vpack.c.b16 %v1575_v54, %v1574_v42  ;;  %v1744_v35 = vshll.u32 %v2803_v15, 16  ;;  %v2892_v54 = vld [vmem:[%s3190_s26 + $0xe8] sm:$0xf] }
  0xb8   : > { %v1751_v19 = vrot.slane %v1749_v63, 4  ;;  %v2016_v59 = vrot.slane %v2014_v41, 5 }
  0xb9   : > { %v694_v16 = vpop.f32.mrf.mxu3 }
  0xba   : > { %v3496_v52 = vadd.f32 %v694_v16, %v519_v2  ;;  %v1768_v2 = vunpack.c.l.b16 %v1719_v48  ;;  %v2805_v16 = vld [vmem:[%s3190_s26 + $0x8c] sm:$0x1]  ;;  %v2017_v12 = vor.u32 %v2016_v59, %v2013_v58  ;;  %v2875_v58 = vld [vmem:[%s3190_s26 + $0xb0] sm:$0xf] }
  0xbb   : > { %2787 = vmatmul.msk.bf16.gmra.mxu2 %vm219_vm1, %v1579_v3  ;;  %v255_v23 = vpop.f32.mrf.mxu0  ;;  %v1769_v3 = vunpack.c.l.b16 %v1733_v49  ;;  %v1758_v36 = vshll.u32 %v2805_v16, 16 }
  0xbc   : > { %v319_v26 = vpop.f32.mrf.mxu1 }
  0xbd   : > { %v3501_v30 = vadd.f32 %v319_v26, %v255_v23  ;;  %v1774_v23 = vpack.c.b16 %v1769_v3, %v1768_v2  ;;  %v2219_v3 = vshrl.u32 %v2892_v54, 16 }
  0xbe   : > { %v503_v34 = vpop.f32.mrf.mxu2  ;;  %2738 = vmatmul.msk.bf16.gmra.mxu0 %vm219_vm1, %v2731_v17  ;;  %2808 = vmatmul.msk.bf16.gmra.mxu3 %vm219_vm1, %v1773_v21  ;;  %v1737_v17 = vrot.slane %v1735_v61, 4  ;;  %v1754_v21 = vrot.slane %v1752_v0, 5  ;;  %v2872_v0 = vld [vmem:[%s3190_s26 + $0xa4] sm:$0x1] }
  0xbf   : > { %v520_v39 = vadd.f32 %v503_v34, %v3466_v20  ;;  %2767 = vmatmul.msk.bf16.gmra.mxu1 %vm219_vm1, %v2760_v24  ;;  %v1543_v20 = vrot.slane %v1541_v37, 4  ;;  %v2735_v24 = vor.u32 %v2932_v6, %v2734_v5  ;;  %v1562_v34 = vrot.slane %v1561_v14, 4 }
  0xc0   : > { %v1741_v38 = vor.u32 %v1740_v18, %v1737_v17  ;;  %v2034_v16 = vshll.u32 %v2872_v0, 16  ;;  %v2891_v18 = vld [vmem:[%s3190_s26 + $0xe4] sm:$0x1] }
  0xc1   : > { %v697_v46 = vpop.f32.mrf.mxu3  ;;  %v1547_v7 = vor.u32 %v1546_v50, %v1543_v20  ;;  %v1567_v49 = vsel %vm3212_vm4, %v1562_v34, %v1566_v31  ;;  %v1746_v20 = vrot.slane %v1744_v35, 5  ;;  %v1760_v50 = vrot.slane %v1758_v36, 5  ;;  %v2937_v31 = vld [vmem:[%s3190_s26 + $0x9c] sm:$0xf0]  ;;  %v2941_v34 = vld [vmem:[%s3190_s26 + $0xe4] sm:$0xf0] }
  0xc2   : > { %v3517_v51 = vadd.f32 %v697_v46, %v520_v39  ;;  %v1755_v39 = vor.u32 %v1754_v21, %v1751_v19  ;;  %v1742_v56 = vrot.slane %v1741_v38, 4  ;;  %v1577_v8 = vunpack.c.l.b16 %v1567_v49 }
  0xc3   : > { %v257_v53 = vpop.f32.mrf.mxu0  ;;  %v1548_v28 = vrot.slane %v1547_v7, 4  ;;  %v2018_v35 = vrot.slane %v2017_v12, 4  ;;  %v2036_v38 = vrot.slane %v2034_v16, 5 }
  0xc4   : > { %v321_v60 = vpop.f32.mrf.mxu1  ;;  %v1756_v57 = vrot.slane %v1755_v39, 4  ;;  %v2214_v39 = vshll.u32 %v2891_v18, 16  ;;  %v2876_v18 = vld [vmem:[%s3190_s26 + $0xb4] sm:$0x1] }
  0xc5   : > { %v3521_v1 = vadd.f32 %v321_v60, %v257_v53  ;;  %v1553_v46 = vsel %vm3212_vm4, %v1548_v28, %v1552_v29  ;;  %v2890_v53 = vld [vmem:[%s3190_s26 + $0xe0] sm:$0xf]  ;;  %v2870_v60 = vld [vmem:[%s3190_s26 + $0x9c] sm:$0x1]  ;;  %v2822_v29 = vld [vmem:[%s3190_s26 + $0x98] sm:$0xf] }
  0xc6   : > { %v505_v4 = vpop.f32.mrf.mxu2  ;;  %v2205_v2 = vshrl.u32 %v2890_v53, 16  ;;  %v1576_v7 = vunpack.c.l.b16 %v1553_v46  ;;  %v2020_v13 = vshll.u32 %v2870_v60, 16  ;;  %v2823_v41 = vor.u32 %v2937_v31, %v2822_v29 }
  0xc7   : > { %v521_v10 = vadd.f32 %v505_v4, %v3486_v55  ;;  %v2871_v55 = vld [vmem:[%s3190_s26 + $0xa0] sm:$0xf]  ;;  %v2222_v4 = vshll.u32 %v2892_v54, 16 }
  0xc8   : > { %v2025_v42 = vshrl.u32 %v2871_v55, 16  ;;  %v2028_v43 = vshll.u32 %v2871_v55, 16  ;;  %v2207_v19 = vrot.slane %v2205_v2, 4  ;;  %v2893_v55 = vld [vmem:[%s3190_s26 + $0xec] sm:$0x1]  ;;  %v2022_v36 = vrot.slane %v2020_v13, 5 }
  0xc9   : > { %v699_v26 = vpop.f32.mrf.mxu3 }
  0xca   : > { %v3532_v32 = vadd.f32 %v699_v26, %v521_v10  ;;  %v2027_v61 = vrot.slane %v2025_v42, 4  ;;  %v2030_v62 = vrot.slane %v2028_v43, 5  ;;  %v1747_v10 = vsel %vm3212_vm4, %v1742_v56, %v1746_v20 }
  0xcb   : > { %2788 = vmatmul.msk.bf16.gmra.mxu2 %vm219_vm1, %v1580_v11  ;;  %v260_v33 = vpop.f32.mrf.mxu0  ;;  %v1761_v11 = vsel %vm3212_vm4, %v1756_v57, %v1760_v50  ;;  %v1581_v26 = vpack.c.b16 %v1577_v8, %v1576_v7  ;;  %v2023_v54 = vsel %vm3212_vm4, %v2018_v35, %v2022_v36  ;;  %v2216_v57 = vrot.slane %v2214_v39, 5 }
  0xcc   : > { %v324_v37 = vpop.f32.mrf.mxu1  ;;  %v2031_v15 = vor.u32 %v2030_v62, %v2027_v61  ;;  %v1771_v28 = vunpack.c.l.b16 %v1761_v11  ;;  %v2124_v7 = vunpack.c.l.b16 %v2023_v54  ;;  %v2877_v54 = vld [vmem:[%s3190_s26 + $0xb8] sm:$0xf] }
  0xcd   : > { %v3535_v22 = vadd.f32 %v324_v37, %v260_v33  ;;  %v2851_v33 = vld [vmem:[%s3190_s26 + $0xe0] sm:$0xf] }
  0xce   : > { %v508_v45 = vpop.f32.mrf.mxu2  ;;  %2739 = vmatmul.msk.bf16.gmra.mxu0 %vm219_vm1, %v2735_v24  ;;  %2809 = vmatmul.msk.bf16.gmra.mxu3 %vm219_vm1, %v1774_v23  ;;  %v2221_v23 = vrot.slane %v2219_v3, 4  ;;  %v2224_v24 = vrot.slane %v2222_v4, 5  ;;  %v2032_v37 = vrot.slane %v2031_v15, 4  ;;  %v2852_v20 = vor.u32 %v2941_v34, %v2851_v33  ;;  %v2938_v33 = vld [vmem:[%s3190_s26 + $0xac] sm:$0xf0] }
  0xcf   : > { %v522_v48 = vadd.f32 %v508_v45, %v3501_v30  ;;  %2768 = vmatmul.msk.bf16.gmra.mxu1 %vm219_vm1, %v2764_v27  ;;  %v2208_v30 = vshll.u32 %v2890_v53, 16  ;;  %v1770_v27 = vunpack.c.l.b16 %v1747_v10  ;;  %v2873_v45 = vld [vmem:[%s3190_s26 + $0xa8] sm:$0xf]  ;;  %v2053_v3 = vshrl.u32 %v2875_v58, 16  ;;  %v2855_v34 = vld [vmem:[%s3190_s26 + $0xf0] sm:$0xf] }
  0xd0   : > { %v2225_v43 = vor.u32 %v2224_v24, %v2221_v23  ;;  %v2037_v56 = vsel %vm3212_vm4, %v2032_v37, %v2036_v38  ;;  %v2039_v59 = vshrl.u32 %v2873_v45, 16  ;;  %v2042_v60 = vshll.u32 %v2873_v45, 16  ;;  %v2942_v38 = vld [vmem:[%s3190_s26 + $0xf4] sm:$0xf0] }
  0xd1   : > { %v702_v63 = vpop.f32.mrf.mxu3  ;;  %v2210_v21 = vrot.slane %v2208_v30, 5  ;;  %v2894_v30 = vld [vmem:[%s3190_s26 + $0xf0] sm:$0xf]  ;;  %v2056_v4 = vshll.u32 %v2875_v58, 16  ;;  %v2125_v8 = vunpack.c.l.b16 %v2037_v56 }
  0xd2   : > { %v3549_v5 = vadd.f32 %v702_v63, %v522_v48  ;;  %v1775_v48 = vpack.c.b16 %v1771_v28, %v1770_v27  ;;  %v2044_v10 = vrot.slane %v2042_v60, 5  ;;  %v2233_v15 = vshrl.u32 %v2894_v30, 16 }
  0xd3   : > { %v262_v6 = vpop.f32.mrf.mxu0  ;;  %v2211_v42 = vor.u32 %v2210_v21, %v2207_v19  ;;  %v2236_v19 = vshll.u32 %v2894_v30, 16  ;;  %v2058_v27 = vrot.slane %v2056_v4, 5  ;;  %v2132_v28 = vpack.c.b16 %v2125_v8, %v2124_v7 }
  0xd4   : > { %v326_v9 = vpop.f32.mrf.mxu1  ;;  %v2070_v7 = vshll.u32 %v2877_v54, 16 }
  0xd5   : > { %v3555_v14 = vadd.f32 %v326_v9, %v262_v6  ;;  %v2212_v63 = vrot.slane %v2211_v42, 4  ;;  %v2896_v6 = vld [vmem:[%s3190_s26 + $0xf8] sm:$0xf]  ;;  %v2041_v9 = vrot.slane %v2039_v59, 4  ;;  %v2895_v42 = vld [vmem:[%s3190_s26 + $0xf4] sm:$0x1] }
  0xd6   : > { %v510_v17 = vpop.f32.mrf.mxu2  ;;  %v2247_v21 = vshrl.u32 %v2896_v6, 16  ;;  %v2250_v23 = vshll.u32 %v2896_v6, 16  ;;  %v2242_v60 = vshll.u32 %v2895_v42, 16  ;;  %v2067_v6 = vshrl.u32 %v2877_v54, 16  ;;  %v2901_v54 = vld [vmem:[%s3190_s26 + $0x10c] sm:$0x1] }
  0xd7   : > { %v523_v25 = vadd.f32 %v510_v17, %v3521_v1  ;;  %v2228_v1 = vshll.u32 %v2893_v55, 16  ;;  %v2217_v12 = vsel %vm3212_vm4, %v2212_v63, %v2216_v57  ;;  %v2826_v55 = vld [vmem:[%s3190_s26 + $0xa8] sm:$0xf]  ;;  %v2045_v35 = vor.u32 %v2044_v10, %v2041_v9 }
  0xd8   : > { %v2318_v29 = vunpack.c.l.b16 %v2217_v12  ;;  %v2252_v45 = vrot.slane %v2250_v23, 5  ;;  %v2878_v23 = vld [vmem:[%s3190_s26 + $0xbc] sm:$0x1] }
  0xd9   : > { %v704_v40 = vpop.f32.mrf.mxu3  ;;  %v2230_v0 = vrot.slane %v2228_v1, 5  ;;  %v2249_v1 = vrot.slane %v2247_v21, 4  ;;  %v2046_v57 = vrot.slane %v2045_v35, 4 }
  0xda   : > { %v3565_v46 = vadd.f32 %v704_v40, %v523_v25  ;;  %v2062_v40 = vshll.u32 %v2876_v18, 16 }
  0xdb   : > { %2789 = vmatmul.msk.bf16.gmra.mxu2 %vm219_vm1, %v1581_v26  ;;  %v775_v49 = vpop.f32.mrf.mxu0  ;;  %v2055_v26 = vrot.slane %v2053_v3, 4 }
  0xdc   : > { %v795_v50 = vadd.f32 %v775_v49, %v3480_v44  ;;  %v858_v53 = vpop.f32.mrf.mxu1  ;;  %v2226_v44 = vrot.slane %v2225_v43, 4  ;;  %v2238_v43 = vrot.slane %v2236_v19, 5  ;;  %v2897_v49 = vld [vmem:[%s3190_s26 + $0xfc] sm:$0x1]  ;;  %v2064_v59 = vrot.slane %v2062_v40, 5 }
  0xdd   : > { %v2900_v19 = vld [vmem:[%s3190_s26 + $0x108] sm:$0xf] }
  0xde   : > { %v513_v61 = vpop.f32.mrf.mxu2  ;;  %v3574_v62 = vadd.f32 %v858_v53, %v795_v50  ;;  %2836 = vmatmul.msk.bf16.vlgmr.msrb.gmra.mxu0 %vm219_vm1, %v2823_v41  ;;  %2810 = vmatmul.msk.bf16.gmra.mxu3 %vm219_vm1, %v1775_v48  ;;  %v2231_v13 = vsel %vm3212_vm4, %v2226_v44, %v2230_v0  ;;  %v2059_v48 = vor.u32 %v2058_v27, %v2055_v26  ;;  %v2880_v26 = vld [vmem:[%s3190_s26 + $0xc4] sm:$0x1] }
  0xdf   : > { %v524_v2 = vadd.f32 %v513_v61, %v3535_v22  ;;  %2865 = vmatmul.msk.bf16.vlgmr.msrb.gmra.mxu1 %vm219_vm1, %v2852_v20  ;;  %v2874_v22 = vld [vmem:[%s3190_s26 + $0xac] sm:$0x1]  ;;  %v2319_v31 = vunpack.c.l.b16 %v2231_v13  ;;  %v2827_v50 = vor.u32 %v2938_v33, %v2826_v55  ;;  %v2856_v53 = vor.u32 %v2942_v38, %v2855_v34  ;;  %v2879_v61 = vld [vmem:[%s3190_s26 + $0xc0] sm:$0xf] }
  0xe0   : > { %v2048_v39 = vshll.u32 %v2874_v22, 16  ;;  %v2253_v0 = vor.u32 %v2252_v45, %v2249_v1  ;;  %v2060_v4 = vrot.slane %v2059_v48, 4  ;;  %v2081_v8 = vshrl.u32 %v2879_v61, 16  ;;  %v2898_v22 = vld [vmem:[%s3190_s26 + $0x100] sm:$0xf] }
  0xe1   : > { %v707_v11 = vpop.f32.mrf.mxu3  ;;  %v2326_v20 = vpack.c.b16 %v2319_v31, %v2318_v29  ;;  %v2084_v9 = vshll.u32 %v2879_v61, 16  ;;  %v2244_v13 = vrot.slane %v2242_v60, 5  ;;  %v2261_v29 = vshrl.u32 %v2898_v22, 16  ;;  %v2830_v61 = vld [vmem:[%s3190_s26 + $0xb8] sm:$0xf] }
  0xe2   : > { %v3587_v16 = vadd.f32 %v707_v11, %v524_v2  ;;  %v2050_v58 = vrot.slane %v2048_v39, 5  ;;  %v2256_v2 = vshll.u32 %v2897_v49, 16  ;;  %v2065_v21 = vsel %vm3212_vm4, %v2060_v4, %v2064_v59 }
  0xe3   : > { %v777_v17 = vpop.f32.mrf.mxu0  ;;  %v2083_v27 = vrot.slane %v2081_v8, 4  ;;  %v2264_v31 = vshll.u32 %v2898_v22, 16  ;;  %v2278_v34 = vshll.u32 %v2900_v19, 16  ;;  %v2127_v38 = vunpack.c.l.b16 %v2065_v21  ;;  %v2883_v21 = vld [vmem:[%s3190_s26 + $0xd0] sm:$0xf] }
  0xe4   : > { %v796_v24 = vadd.f32 %v777_v17, %v3496_v52  ;;  %v860_v25 = vpop.f32.mrf.mxu1  ;;  %v2235_v52 = vrot.slane %v2233_v15, 4  ;;  %v2051_v12 = vsel %vm3212_vm4, %v2046_v57, %v2050_v58  ;;  %v2254_v17 = vrot.slane %v2253_v0, 4  ;;  %v2943_v0 = vld [vmem:[%s3190_s26 + $0x104] sm:$0xf0] }
  0xe5   : > { %v2258_v18 = vrot.slane %v2256_v2, 5  ;;  %v2126_v33 = vunpack.c.l.b16 %v2051_v12  ;;  %v2090_v1 = vshll.u32 %v2880_v26, 16  ;;  %v2263_v48 = vrot.slane %v2261_v29, 4 }
  0xe6   : > { %v515_v36 = vpop.f32.mrf.mxu2  ;;  %v3594_v37 = vadd.f32 %v860_v25, %v796_v24  ;;  %v2239_v44 = vor.u32 %v2238_v43, %v2235_v52  ;;  %v2069_v24 = vrot.slane %v2067_v6, 4  ;;  %v2072_v25 = vrot.slane %v2070_v7, 5 }
  0xe7   : > { %v525_v41 = vadd.f32 %v515_v36, %v3555_v14  ;;  %v2259_v40 = vsel %vm3212_vm4, %v2254_v17, %v2258_v18  ;;  %v2076_v43 = vshll.u32 %v2878_v23, 16  ;;  %v2266_v49 = vrot.slane %v2264_v31, 5 }
  0xe8   : > { %v2240_v15 = vrot.slane %v2239_v44, 4  ;;  %v2073_v42 = vor.u32 %v2072_v25, %v2069_v24  ;;  %v2280_v57 = vrot.slane %v2278_v34, 5  ;;  %v2133_v58 = vpack.c.b16 %v2127_v38, %v2126_v33  ;;  %v2859_v44 = vld [vmem:[%s3190_s26 + $0x100] sm:$0xf]  ;;  %v2902_v34 = vld [vmem:[%s3190_s26 + $0x110] sm:$0xf] }
  0xe9   : > { %v709_v56 = vpop.f32.mrf.mxu3  ;;  %v2321_v60 = vunpack.c.l.b16 %v2259_v40  ;;  %v2267_v6 = vor.u32 %v2266_v49, %v2263_v48  ;;  %v2284_v8 = vshll.u32 %v2901_v54, 16  ;;  %v2109_v33 = vshrl.u32 %v2883_v21, 16 }
  0xea   : > { %v3602_v63 = vadd.f32 %v709_v56, %v525_v41  ;;  %v2245_v39 = vsel %vm3212_vm4, %v2240_v15, %v2244_v13  ;;  %v2074_v2 = vrot.slane %v2073_v42, 4  ;;  %v2881_v15 = vld [vmem:[%s3190_s26 + $0xc8] sm:$0xf] }
  0xeb   : > { %2886 = vmatmul.msk.bf16.vlgmr.msrb.gmra.mxu2 %vm219_vm1, %v2132_v28  ;;  %v780_v14 = vpop.f32.mrf.mxu0  ;;  %v2086_v28 = vrot.slane %v2084_v9, 5  ;;  %v2320_v59 = vunpack.c.l.b16 %v2245_v39  ;;  %v2268_v24 = vrot.slane %v2267_v6, 4  ;;  %v2286_v26 = vrot.slane %v2284_v8, 5  ;;  %v2904_v39 = vld [vmem:[%s3190_s26 + $0x118] sm:$0xf] }
  0xec   : > { %v797_v30 = vadd.f32 %v780_v14, %v3517_v51  ;;  %v863_v3 = vpop.f32.mrf.mxu1  ;;  %v2939_v14 = vld [vmem:[%s3190_s26 + $0xbc] sm:$0xf0]  ;;  %v2098_v31 = vshll.u32 %v2881_v15, 16  ;;  %v2111_v48 = vrot.slane %v2109_v33, 4  ;;  %v2944_v6 = vld [vmem:[%s3190_s26 + $0x114] sm:$0xf0] }
  0xed   : > { %v2087_v45 = vor.u32 %v2086_v28, %v2083_v27  ;;  %v2327_v13 = vpack.c.b16 %v2321_v60, %v2320_v59 }
  0xee   : > { %v1052_v10 = vpop.f32.mrf.mxu2  ;;  %v3606_v11 = vadd.f32 %v863_v3, %v797_v30  ;;  %2837 = vmatmul.msk.bf16.gmra.mxu0 %vm219_vm1, %v2827_v50  ;;  %2907 = vmatmul.msk.bf16.vlgmr.msrb.gmra.mxu3 %vm219_vm1, %v2326_v20  ;;  %v2078_v30 = vrot.slane %v2076_v43, 5  ;;  %v2092_v3 = vrot.slane %v2090_v1, 5  ;;  %v2100_v43 = vrot.slane %v2098_v31, 5 }
  0xef   : > { %v1072_v51 = vadd.f32 %v1052_v10, %v3574_v62  ;;  %2866 = vmatmul.msk.bf16.gmra.mxu1 %vm219_vm1, %v2856_v53  ;;  %v2275_v62 = vshrl.u32 %v2900_v19, 16  ;;  %v2899_v53 = vld [vmem:[%s3190_s26 + $0x104] sm:$0x1]  ;;  %v2088_v4 = vrot.slane %v2087_v45, 4  ;;  %v2831_v10 = vor.u32 %v2939_v14, %v2830_v61  ;;  %v2882_v45 = vld [vmem:[%s3190_s26 + $0xcc] sm:$0x1] }
  0xf0   : > { %v2270_v7 = vshll.u32 %v2899_v53, 16  ;;  %v2079_v19 = vsel %vm3212_vm4, %v2074_v2, %v2078_v30  ;;  %v2104_v30 = vshll.u32 %v2882_v45, 16 }
  0xf1   : > { %v1246_v55 = vpop.f32.mrf.mxu3  ;;  %v2277_v56 = vrot.slane %v2275_v62, 4  ;;  %v2093_v23 = vsel %vm3212_vm4, %v2088_v4, %v2092_v3  ;;  %v2112_v62 = vshll.u32 %v2883_v21, 16  ;;  %v2863_v4 = vld [vmem:[%s3190_s26 + $0x110] sm:$0xf] }
  0xf2   : > { %v3620_v35 = vadd.f32 %v1246_v55, %v1072_v51  ;;  %v2860_v51 = vor.u32 %v2943_v0, %v2859_v44  ;;  %v2272_v25 = vrot.slane %v2270_v7, 5  ;;  %v2129_v38 = vunpack.c.l.b16 %v2093_v23  ;;  %v2834_v44 = vld [vmem:[%s3190_s26 + $0xc8] sm:$0xf]  ;;  %v2940_v0 = vld [vmem:[%s3190_s26 + $0xcc] sm:$0xf0] }
  0xf3   : > { %v782_v36 = vpop.f32.mrf.mxu0  ;;  %v2281_v12 = vor.u32 %v2280_v57, %v2277_v56  ;;  %v2114_v49 = vrot.slane %v2112_v62, 5  ;;  %v2884_v56 = vld [vmem:[%s3190_s26 + $0xd4] sm:$0x1]  ;;  %v2292_v57 = vshll.u32 %v2902_v34, 16  ;;  %v2106_v23 = vrot.slane %v2104_v30, 5 }
  0xf4   : > { %v798_v52 = vadd.f32 %v782_v36, %v3532_v32  ;;  %v865_v41 = vpop.f32.mrf.mxu1  ;;  %v2128_v36 = vunpack.c.l.b16 %v2079_v19  ;;  %v2118_v8 = vshll.u32 %v2884_v56, 16  ;;  %v2864_v19 = vor.u32 %v2944_v6, %v2863_v4 }
  0xf5   : > { %v2282_v29 = vrot.slane %v2281_v12, 4  ;;  %v2115_v7 = vor.u32 %v2114_v49, %v2111_v48  ;;  %v2294_v12 = vrot.slane %v2292_v57, 5 }
  0xf6   : > { %v1054_v20 = vpop.f32.mrf.mxu2  ;;  %v3627_v50 = vadd.f32 %v865_v41, %v798_v52  ;;  %v2273_v52 = vsel %vm3212_vm4, %v2268_v24, %v2272_v25 }
  0xf7   : > { %v1073_v32 = vadd.f32 %v1054_v20, %v3594_v37  ;;  %v2287_v41 = vsel %vm3212_vm4, %v2282_v29, %v2286_v26  ;;  %v2289_v20 = vshrl.u32 %v2902_v34, 16  ;;  %v2322_v59 = vunpack.c.l.b16 %v2273_v52 }
  0xf8   : > { %v2323_v14 = vunpack.c.l.b16 %v2287_v41  ;;  %v2116_v25 = vrot.slane %v2115_v7, 4  ;;  %v2120_v26 = vrot.slane %v2118_v8, 5 }
  0xf9   : > { %v1248_v9 = vpop.f32.mrf.mxu3 }
  0xfa   : > { %v3636_v37 = vadd.f32 %v1248_v9, %v1073_v32  ;;  %v2303_v32 = vshrl.u32 %v2904_v39, 16  ;;  %v2903_v9 = vld [vmem:[%s3190_s26 + $0x114] sm:$0x1] }
  0xfb   : > { %2887 = vmatmul.msk.bf16.gmra.mxu2 %vm219_vm1, %v2133_v58  ;;  %v785_v22 = vpop.f32.mrf.mxu0  ;;  %v2306_v58 = vshll.u32 %v2904_v39, 16 }
  0xfc   : > { %v799_v17 = vadd.f32 %v785_v22, %v3549_v5  ;;  %v868_v18 = vpop.f32.mrf.mxu1  ;;  %v2095_v5 = vshrl.u32 %v2881_v15, 16  ;;  %v2905_v15 = vld [vmem:[%s3190_s26 + $0x11c] sm:$0x1] }
  0xfd   : > { %v2308_v22 = vrot.slane %v2306_v58, 5  ;;  %v2312_v33 = vshll.u32 %v2905_v15, 16 }
  0xfe   : > { %v1057_v27 = vpop.f32.mrf.mxu2  ;;  %v3646_v28 = vadd.f32 %v868_v18, %v799_v17  ;;  %2838 = vmatmul.msk.bf16.gmra.mxu0 %vm219_vm1, %v2831_v10  ;;  %2908 = vmatmul.msk.bf16.gmra.mxu3 %vm219_vm1, %v2327_v13  ;;  %v2097_v42 = vrot.slane %v2095_v5, 4  ;;  %v2291_v10 = vrot.slane %v2289_v20, 4  ;;  %v2305_v13 = vrot.slane %v2303_v32, 4 }
  0xff   : > { %v1074_v55 = vadd.f32 %v1057_v27, %v3606_v11  ;;  %2867 = vmatmul.msk.bf16.gmra.mxu1 %vm219_vm1, %v2860_v51  ;;  %v2835_v51 = vor.u32 %v2940_v0, %v2834_v44  ;;  %v2328_v18 = vpack.c.b16 %v2323_v14, %v2322_v59  ;;  %v2298_v27 = vshll.u32 %v2903_v9, 16 }
 0x100   : > { %v2101_v2 = vor.u32 %v2100_v43, %v2097_v42  ;;  %v2295_v31 = vor.u32 %v2294_v12, %v2291_v10  ;;  %v2314_v41 = vrot.slane %v2312_v33, 5 }
 0x101   : > { %v1251_v40 = vpop.f32.mrf.mxu3  ;;  %v2300_v39 = vrot.slane %v2298_v27, 5 }
 0x102   : > { %v3658_v1 = vadd.f32 %v1251_v40, %v1074_v55  ;;  %v2102_v21 = vrot.slane %v2101_v2, 4  ;;  %v2309_v55 = vor.u32 %v2308_v22, %v2305_v13  ;;  %v2296_v40 = vrot.slane %v2295_v31, 4 }
 0x103   : > { %v787_v11 = vpop.f32.mrf.mxu0 }
 0x104   : > { %v800_v53 = vadd.f32 %v787_v11, %v3565_v46  ;;  %v870_v54 = vpop.f32.mrf.mxu1  ;;  %v2134_v46 = vpack.c.b16 %v2129_v38, %v2128_v36  ;;  %v2107_v38 = vsel %vm3212_vm4, %v2102_v21, %v2106_v23  ;;  %v2310_v52 = vrot.slane %v2309_v55, 4 }
 0x105   : > { %v2130_v45 = vunpack.c.l.b16 %v2107_v38  ;;  %v2301_v20 = vsel %vm3212_vm4, %v2296_v40, %v2300_v39 }
 0x106   : > { %v1059_v60 = vpop.f32.mrf.mxu2  ;;  %v883_v61 = vadd.f32 %v870_v54, %v800_v53  ;;  %v2315_v53 = vsel %vm3212_vm4, %v2310_v52, %v2314_v41  ;;  %v2324_v58 = vunpack.c.l.b16 %v2301_v20 }
 0x107   : > { %v1075_v3 = vadd.f32 %v1059_v60, %v3627_v50  ;;  %v2325_v59 = vunpack.c.l.b16 %v2315_v53 }
 0x109   : > { %v1253_v17 = vpop.f32.mrf.mxu3  ;;  %v2329_v44 = vpack.c.b16 %v2325_v59, %v2324_v58 }
 0x10a   : > { %v3670_v24 = vadd.f32 %v1253_v17, %v1075_v3 }
 0x10b   : > { %2888 = vmatmul.msk.bf16.gmra.mxu2 %vm219_vm1, %v2134_v46  ;;  %v790_v50 = vpop.f32.mrf.mxu0 }
 0x10c   : > { %v801_v29 = vadd.f32 %v790_v50, %v3587_v16  ;;  %v873_v5 = vpop.f32.mrf.mxu1  ;;  %v2121_v16 = vsel %vm3212_vm4, %v2116_v25, %v2120_v26 }
 0x10d   : > { %v2131_v48 = vunpack.c.l.b16 %v2121_v16 }
 0x10e   : > { %v1062_v62 = vpop.f32.mrf.mxu2  ;;  %v884_v34 = vadd.f32 %v873_v5, %v801_v29  ;;  %2839 = vmatmul.msk.bf16.gmra.mxu0 %vm219_vm1, %v2835_v51  ;;  %2909 = vmatmul.msk.bf16.gmra.mxu3 %vm219_vm1, %v2328_v18 }
 0x10f   : > { %v1076_v36 = vadd.f32 %v1062_v62, %v3646_v28  ;;  %2868 = vmatmul.msk.bf16.gmra.mxu1 %vm219_vm1, %v2864_v19  ;;  %v2135_v32 = vpack.c.b16 %v2131_v48, %v2130_v45 }
 0x111   : > { %v1256_v42 = vpop.f32.mrf.mxu3 }
 0x112   : > { %v1270_v43 = vadd.f32 %v1256_v42, %v1076_v36 }
 0x113   : > { %v792_v11 = vpop.f32.mrf.mxu0 }
 0x114   : > { %v802_v49 = vadd.f32 %v792_v11, %v3602_v63  ;;  %v875_v28 = vpop.f32.mrf.mxu1 }
 0x116   : > { %v1064_v54 = vpop.f32.mrf.mxu2  ;;  %v885_v56 = vadd.f32 %v875_v28, %v802_v49 }
 0x117   : > { %v1077_v57 = vadd.f32 %v1064_v54, %v883_v61 }
 0x119   : > { %v1258_v60 = vpop.f32.mrf.mxu3 }
 0x11a   : > { %v1271_v14 = vadd.f32 %v1258_v60, %v1077_v57 }
 0x11b   : > { %2889 = vmatmul.msk.bf16.gmra.mxu2 %vm219_vm1, %v2135_v32  ;;  %v1329_v0 = vpop.f32.mrf.mxu0 }
 0x11c   : > { %v1349_v63 = vadd.f32 %v1329_v0, %v3620_v35  ;;  %v1412_v2 = vpop.f32.mrf.mxu1 }
 0x11e   : > { %v1067_v30 = vpop.f32.mrf.mxu2  ;;  %v1432_v3 = vadd.f32 %v1412_v2, %v1349_v63  ;;  %2910 = vmatmul.msk.bf16.gmra.mxu3 %vm219_vm1, %v2329_v44 }
 0x11f   : > { %v1078_v47 = vadd.f32 %v1067_v30, %v884_v34 }
 0x121   : > { %v1261_v46 = vpop.f32.mrf.mxu3 }
 0x122   : > { %v3690_v4 = vadd.f32 %v1261_v46, %v1078_v47 }
 0x123   : > { %v1331_v61 = vpop.f32.mrf.mxu0 }
 0x124   : > { %v1350_v6 = vadd.f32 %v1331_v61, %v3636_v37  ;;  %v1414_v7 = vpop.f32.mrf.mxu1 }
 0x126   : > { %v1069_v8 = vpop.f32.mrf.mxu2  ;;  %v1433_v9 = vadd.f32 %v1414_v7, %v1350_v6 }
 0x127   : > { %v1079_v10 = vadd.f32 %v1069_v8, %v885_v56 }
 0x129   : > { %v1263_v12 = vpop.f32.mrf.mxu3 }
 0x12a   : > { %v3693_v13 = vadd.f32 %v1263_v12, %v1079_v10 }
 0x12b   : > { %v1334_v35 = vpop.f32.mrf.mxu0 }
 0x12c   : > { %v1351_v22 = vadd.f32 %v1334_v35, %v3658_v1  ;;  %v1417_v51 = vpop.f32.mrf.mxu1 }
 0x12e   : > { %v1606_v15 = vpop.f32.mrf.mxu2  ;;  %v1434_v17 = vadd.f32 %v1417_v51, %v1351_v22 }
 0x12f   : > { %v1626_v18 = vadd.f32 %v1606_v15, %v1432_v3 }
 0x131   : > { %v1800_v19 = vpop.f32.mrf.mxu3 }
 0x132   : > { %v1820_v21 = vadd.f32 %v1800_v19, %v1626_v18 }
 0x133   : > { %v1336_v23 = vpop.f32.mrf.mxu0 }
 0x134   : > { %v1352_v50 = vadd.f32 %v1336_v23, %v3670_v24  ;;  %v1419_v37 = vpop.f32.mrf.mxu1 }
 0x136   : > { %v1608_v25 = vpop.f32.mrf.mxu2  ;;  %v1435_v26 = vadd.f32 %v1419_v37, %v1352_v50 }
 0x137   : > { %v1627_v27 = vadd.f32 %v1608_v25, %v1433_v9 }
 0x139   : > { %v1802_v29 = vpop.f32.mrf.mxu3 }
 0x13a   : > { %v1821_v5 = vadd.f32 %v1802_v29, %v1627_v27 }
 0x13b   : > { %v1339_v31 = vpop.f32.mrf.mxu0 }
 0x13c   : > { %v1353_v55 = vadd.f32 %v1339_v31, %v1270_v43  ;;  %v1422_v33 = vpop.f32.mrf.mxu1 }
 0x13e   : > { %v1611_v62 = vpop.f32.mrf.mxu2  ;;  %v1436_v1 = vadd.f32 %v1422_v33, %v1353_v55 }
 0x13f   : > { %v1628_v34 = vadd.f32 %v1611_v62, %v1434_v17 }
 0x141   : > { %v1805_v36 = vpop.f32.mrf.mxu3 }
 0x142   : > { %v1822_v38 = vadd.f32 %v1805_v36, %v1628_v34 }
 0x143   : > { %v1341_v39 = vpop.f32.mrf.mxu0 }
 0x144   : > { %v1354_v16 = vadd.f32 %v1341_v39, %v1271_v14  ;;  %v1424_v40 = vpop.f32.mrf.mxu1 }
 0x146   : > { %v1613_v52 = vpop.f32.mrf.mxu2  ;;  %v1437_v41 = vadd.f32 %v1424_v40, %v1354_v16 }
 0x147   : > { %v1629_v24 = vadd.f32 %v1613_v52, %v1435_v26 }
 0x149   : > { %v1807_v42 = vpop.f32.mrf.mxu3 }
 0x14a   : > { %v1823_v11 = vadd.f32 %v1807_v42, %v1629_v24 }
 0x14b   : > { %v1344_v45 = vpop.f32.mrf.mxu0 }
 0x14c   : > { %v3697_v48 = vpop.f32.mrf.mxu1  ;;  %v1355_v24 = vadd.f32 %v1344_v45, %v3690_v4 }
 0x14e   : > { %v1616_v49 = vpop.f32.mrf.mxu2 }
 0x14f   : > { %v1630_v28 = vadd.f32 %v1616_v49, %v1436_v1 }
 0x151   : > { %v1810_v43 = vpop.f32.mrf.mxu3 }
 0x152   : > { %v1824_v20 = vadd.f32 %v1810_v43, %v1630_v28 }
 0x153   : > { %v3699_v53 = vpop.f32.mrf.mxu0 }
 0x154   : > { %v3701_v54 = vpop.f32.mrf.mxu1 }
 0x156   : > { %v1618_v56 = vpop.f32.mrf.mxu2 }
 0x157   : > { %v1631_v57 = vadd.f32 %v1618_v56, %v1437_v41 }
 0x159   : > { %v1812_v32 = vpop.f32.mrf.mxu3 }
 0x15a   : > { %v1825_v58 = vadd.f32 %v1812_v32, %v1631_v57  ;;  %v1438_v32 = vadd.f32 %v3697_v48, %v1355_v24 }
 0x15b   : > { %v1883_v59 = vpop.f32.mrf.mxu0 }
 0x15c   : > { %v1966_v60 = vpop.f32.mrf.mxu1  ;;  %v1903_v46 = vadd.f32 %v1883_v59, %v1820_v21 }
 0x15e   : > { %v1621_v14 = vpop.f32.mrf.mxu2  ;;  %v1986_v8 = vadd.f32 %v1966_v60, %v1903_v46 }
 0x161   : > { %v3703_v44 = vpop.f32.mrf.mxu3 }
 0x163   : > { %v1885_v0 = vpop.f32.mrf.mxu0 }
 0x164   : > { %v1968_v2 = vpop.f32.mrf.mxu1  ;;  %v1904_v6 = vadd.f32 %v1885_v0, %v1821_v5  ;;  %v1632_v0 = vadd.f32 %v1621_v14, %v1438_v32 }
 0x166   : > { %v3705_v63 = vpop.f32.mrf.mxu2  ;;  %v1987_v9 = vadd.f32 %v1968_v2, %v1904_v6 }
 0x169   : > { %v3707_v30 = vpop.f32.mrf.mxu3 }
 0x16b   : > { %v1888_v3 = vpop.f32.mrf.mxu0 }
 0x16c   : > { %v1971_v61 = vpop.f32.mrf.mxu1  ;;  %v1905_v51 = vadd.f32 %v1888_v3, %v1822_v38 }
 0x16e   : > { %v2160_v47 = vpop.f32.mrf.mxu2  ;;  %v1988_v50 = vadd.f32 %v1971_v61, %v1905_v51  ;;  %v1826_v61 = vadd.f32 %v3703_v44, %v1632_v0 }
 0x16f   : > { %v2180_v10 = vadd.f32 %v2160_v47, %v1986_v8 }
 0x171   : > { %v2354_v7 = vpop.f32.mrf.mxu3 }
 0x172   : > { %v2374_v15 = vadd.f32 %v2354_v7, %v2180_v10 }
 0x173   : > { %v1890_v12 = vpop.f32.mrf.mxu0 }
 0x174   : > { %v1973_v18 = vpop.f32.mrf.mxu1  ;;  %v2396_v23 = vmul.f32 %v2374_v15, %v2374_v15  ;;  %v1906_v5 = vadd.f32 %v1890_v12, %v1823_v11 }
 0x176   : > { %v2162_v35 = vpop.f32.mrf.mxu2  ;;  %v1989_v62 = vadd.f32 %v1973_v18, %v1906_v5 }
 0x177   : > { %v2181_v22 = vadd.f32 %v2162_v35, %v1987_v9 }
 0x179   : > { %v2356_v17 = vpop.f32.mrf.mxu3 }
 0x17a   : > { %v2375_v19 = vadd.f32 %v2356_v17, %v2181_v22 }
 0x17b   : > { %v1893_v29 = vpop.f32.mrf.mxu0 }
 0x17c   : > { %v2382_v37 = vadd.f32 %v2375_v19, %v2374_v15  ;;  %v2397_v25 = vmul.f32 %v2375_v19, %v2375_v19  ;;  %v1976_v33 = vpop.f32.mrf.mxu1  ;;  %v1907_v16 = vadd.f32 %v1893_v29, %v1824_v20  ;;  %v1356_v20 = vadd.f32 %v3699_v53, %v3693_v13 }
 0x17e   : > { %v2165_v26 = vpop.f32.mrf.mxu2  ;;  %v2404_v21 = vadd.f32 %v2397_v25, %v2396_v23  ;;  %v1990_v42 = vadd.f32 %v1976_v33, %v1907_v16  ;;  %v1439_v9 = vadd.f32 %v3701_v54, %v1356_v20 }
 0x17f   : > { %v2182_v27 = vadd.f32 %v2165_v26, %v1988_v50 }
 0x180   : > { %v1633_v14 = vadd.f32 %v3705_v63, %v1439_v9 }
 0x181   : > { %v2359_v31 = vpop.f32.mrf.mxu3 }
 0x182   : > { %v2376_v55 = vadd.f32 %v2359_v31, %v2182_v27  ;;  %v1827_v51 = vadd.f32 %v3707_v30, %v1633_v14 }
 0x183   : > { %v1895_v40 = vpop.f32.mrf.mxu0 }
 0x184   : > { %v2383_v1 = vadd.f32 %v2382_v37, %v2376_v55  ;;  %v2398_v34 = vmul.f32 %v2376_v55, %v2376_v55  ;;  %v1978_v43 = vpop.f32.mrf.mxu1  ;;  %v1908_v59 = vadd.f32 %v1895_v40, %v1825_v58 }
 0x186   : > { %v2167_v36 = vpop.f32.mrf.mxu2  ;;  %v2405_v38 = vadd.f32 %v2404_v21, %v2398_v34  ;;  %v1991_v47 = vadd.f32 %v1978_v43, %v1908_v59 }
 0x187   : > { %v2183_v39 = vadd.f32 %v2167_v36, %v1989_v62 }
 0x189   : > { %v2361_v52 = vpop.f32.mrf.mxu3 }
 0x18a   : > { %v2377_v41 = vadd.f32 %v2361_v52, %v2183_v39 }
 0x18b   : > { %v1898_v3 = vpop.f32.mrf.mxu0 }
 0x18c   : > { %v2384_v49 = vadd.f32 %v2383_v1, %v2377_v41  ;;  %v2399_v28 = vmul.f32 %v2377_v41, %v2377_v41  ;;  %v1981_v8 = vpop.f32.mrf.mxu1  ;;  %v1909_v48 = vadd.f32 %v1898_v3, %v1826_v61 }
 0x18e   : > { %v2170_v11 = vpop.f32.mrf.mxu2  ;;  %v2406_v56 = vadd.f32 %v2405_v38, %v2399_v28  ;;  %v1992_v12 = vadd.f32 %v1981_v8, %v1909_v48 }
 0x18f   : > { %v2184_v57 = vadd.f32 %v2170_v11, %v1990_v42 }
 0x191   : > { %v2364_v60 = vpop.f32.mrf.mxu3 }
 0x192   : > { %v2378_v2 = vadd.f32 %v2364_v60, %v2184_v57 }
 0x193   : > { %v1900_v13 = vpop.f32.mrf.mxu0 }
 0x194   : > { %v2385_v46 = vadd.f32 %v2384_v49, %v2378_v2  ;;  %v2400_v4 = vmul.f32 %v2378_v2, %v2378_v2  ;;  %v1910_v44 = vadd.f32 %v1900_v13, %v1827_v51  ;;  %v1983_v18 = vpop.f32.mrf.mxu1 }
 0x196   : > { %v2172_v45 = vpop.f32.mrf.mxu2  ;;  %v2407_v6 = vadd.f32 %v2406_v56, %v2400_v4  ;;  %v1993_v54 = vadd.f32 %v1983_v18, %v1910_v44 }
 0x197   : > { %v2185_v7 = vadd.f32 %v2172_v45, %v1991_v47 }
 0x199   : > { %v2366_v58 = vpop.f32.mrf.mxu3 }
 0x19a   : > { %v2379_v10 = vadd.f32 %v2366_v58, %v2185_v7 }
 0x19c   : > { %v2386_v35 = vadd.f32 %v2385_v46, %v2379_v10  ;;  %v2401_v22 = vmul.f32 %v2379_v10, %v2379_v10 }
 0x19e   : > { %v2175_v53 = vpop.f32.mrf.mxu2  ;;  %v2408_v15 = vadd.f32 %v2407_v6, %v2401_v22 }
 0x19f   : > { %v2186_v17 = vadd.f32 %v2175_v53, %v1992_v12 }
 0x1a1   : > { %v2369_v19 = vpop.f32.mrf.mxu3 }
 0x1a2   : > { %v2380_v23 = vadd.f32 %v2369_v19, %v2186_v17 }
 0x1a4   : > { %v2387_v50 = vadd.f32 %v2386_v35, %v2380_v23  ;;  %v2402_v37 = vmul.f32 %v2380_v23, %v2380_v23 }
 0x1a6   : > { %v2177_v63 = vpop.f32.mrf.mxu2  ;;  %v2409_v25 = vadd.f32 %v2408_v15, %v2402_v37 }
 0x1a7   : > { %v2187_v26 = vadd.f32 %v2177_v63, %v1993_v54 }
 0x1a9   : > { %v2371_v21 = vpop.f32.mrf.mxu3 }
 0x1aa   : > { %v2381_v27 = vadd.f32 %v2371_v21, %v2187_v26 }
 0x1ac   : > { %v2388_v29 = vadd.f32 %v2387_v50, %v2381_v27  ;;  %v2403_v5 = vmul.f32 %v2381_v27, %v2381_v27 }
 0x1ae   : > { %v2389_v30 = vrot.slane %v2388_v29, 4  ;;  %v2410_v31 = vadd.f32 %v2409_v25, %v2403_v5 }
 0x1b0   : > { %v2390_v55 = vadd.f32 %v2389_v30, %v2388_v29  ;;  %v2411_v33 = vrot.slane %v2410_v31, 4 }
 0x1b2   : > { %v2391_v62 = vrot.slane %v2390_v55, 2  ;;  %v2412_v1 = vadd.f32 %v2411_v33, %v2410_v31 }
 0x1b4   : > { %v2392_v34 = vadd.f32 %v2391_v62, %v2390_v55  ;;  %v2413_v36 = vrot.slane %v2412_v1, 2 }
 0x1b6   : > { %v2393_v38 = vrot.slane %v2392_v34, 1  ;;  %v2414_v39 = vadd.f32 %v2413_v36, %v2412_v1 }
 0x1b8   : > { %v2394_v16 = vadd.f32 %v2393_v38, %v2392_v34  ;;  %v2415_v40 = vrot.slane %v2414_v39, 1 }
 0x1ba   : > { %2395 = vst [vmem:[%s166_s5] sm:$0x1] %v2394_v16  ;;  %v2416_v52 = vadd.f32 %v2415_v40, %v2414_v39 }
 0x1bb   : > { %3017 = shalt.err (!%p3014_p3)
}
 0x1bc   : > { %2946 = dma.vmem_to_hbm [thread:$0]  (%p3144_p5), %s2434_s6, 16, %s2436_s7, %s2419_s16   ;;  %2417 = vst [vmem:[%s172_s8] sm:$0x1] %v2416_v52 }
 0x1bd   : > { %s2423_s28 = scalar_lea.sflag [#allocation5], %s3718_s25  ;;  %s3032_s29 = sshra.s32 %s2449_s10, 4  ;;  %s3033_s29 = int_to_ptr.hbm [resolvable:$true] %s3032_s29 }
 0x1be   : > { %s3034_s30 = scalar_lea.hbm %s3033_s29, 1  ;;  %s3038_s11 = scalar_lea.hbm %s3790_s3, 2 }
 0x1bf   : > { %p3035_p4 = scmp.ne.s32.totalorder %s3033_s29, %s3034_s30  ;;  %p3039_p9 = scmp.lt.s32.totalorder %s3033_s29, %s3790_s3 }
 0x1c0   : > { %p3040_p10 = scmp.lt.s32.totalorder %s3038_s11, %s3034_s30 }
 0x1c1   : > { %p3036_p7 = pnand %p3035_p4, %p3144_p5 }
 0x1c2   : > { %p3041_p11 = por %p3040_p10, %p3039_p9 }
 0x1c3   : > { %p3037_p8 = pneg %p3036_p7 }
 0x1c5   : > { %p3042_p12 = pnand %p3041_p11, %p3037_p8 }
 0x1c7   : > { %3045 = shalt.err (!%p3042_p12)
}
 0x1c8   : > { %2947 = dma.vmem_to_hbm [thread:$0]  (%p3144_p5), %s2447_s9, 16, %s2449_s10, %s2423_s28  }
 0x1c9 PF: > { %p2957_p13 = scmp.ge.s32.totalorder %s3084_s15, 2  ;;  %s2460_s25 = sand.u32 1, %s3072_s12  }
 0x1ca   : > { %s2461_s6 = scalar_lea.sflag [#allocation3], %s2460_s25 }
 0x1cb   : > { %p2951_p0 = pnand %p2957_p13, %p3148_p6 }
 0x1cd   : > { %p2952_p1 = pneg %p2951_p0 }
 0x1cf   : > { %3063 = dma.done.wait (%p2952_p1), %s2461_s6, 16  }
 0x1d0   : > { %3065 = vsyncadd (%p2952_p1), %s2461_s6, 4294967280  ;;  %s2470_s7 = scalar_lea.sflag [#allocation5], %s2460_s25 }
 0x1d1   : > { %3067 = dma.done.wait (%p2952_p1), %s2470_s7, 16  }
 0x1d2   : > { %3069 = vsyncadd (%p2952_p1), %s2470_s7, 4294967280  ;;  %p17_p5 = scmp.ge.s32.totalorder %s3131_s18, 4   ;;  %s3795_s12 = smov %s3076_s13 }
 0x1d3   : > { %s3796_s13 = smov %s3080_s14  ;;  %s3797_s14 = smov %s3142_s21 }
 0x1d4   : > { %s3798_s15 = smov %s3131_s18  ;;  %19 = sbr.rel (!%p17_p5) target bundleno = 5 (0x5), region = 102 }
 0x1d9   :  { %2475 = vsyncpa [#allocation3], 1 }
 0x1da   :  { %2477 = vsyncpa [#allocation3 + $0x1], 1 }
 0x1db   :  { %2478 = vsyncpa [#allocation5], 1 }
 0x1dc   :  { %2480 = vsyncpa [#allocation5 + $0x1], 1 }

</bundles_post_ra>
